<compile_context>
chip_gen: v7x
topology: tpu7x:2x2x1
jax: 0.10.0
libtpu: 0.0.40
codegen_flags: <defaults>
</compile_context>

<pallas_src>
import functools
import math
import warnings

import jax
import jax.numpy as jnp
from jax.experimental import pallas as pl
from jax.experimental.pallas import tpu as pltpu

EPS = 1e-6
# stands in for config.causal_mask_value (float("-inf") in the torch module);
# finite large-negative avoids NaN in the online-softmax rescaling.
MASK_VALUE = -2.3819763e38

PARAM_DTYPE = jnp.bfloat16   # bf16 weights -> full-rate MXU, half the HBM bytes
ACT_DTYPE = jnp.bfloat16


def _pick_tile(dim, target):
    """Largest tile <= target that divides dim, preferring 128-multiples."""
    if dim <= target:
        return dim
    for t in range(target - target % 128, 0, -128):
        if t > 0 and dim % t == 0:
            return t
    for t in range(target, 0, -1):
        if dim % t == 0:
            return t
    return dim


# ----------------------------- Pallas kernels ------------------------------


def _norm_matmul_kernel(x_ref, g_ref, w_ref, o_ref):
    """out = rmsnorm(x) @ w   (RMSNorm fused into the matmul prologue)."""
    x = x_ref[...].astype(jnp.float32)
    var = jnp.mean(x * x, axis=-1, keepdims=True)
    xn = x * jax.lax.rsqrt(var + EPS) * (1.0 + g_ref[...].astype(jnp.float32))
    o_ref[...] = jnp.dot(xn.astype(w_ref.dtype), w_ref[...],
                         preferred_element_type=jnp.float32).astype(o_ref.dtype)


def norm_matmul(x, norm_w, w):
    """x: (M, D), norm_w: (D,), w: (D, N) -> (M, N); full-D K (norm needs the row)."""
    m, d = x.shape
    n = w.shape[1]
    tm = _pick_tile(m, 256)
    tn = _pick_tile(n, 256)
    return pl.pallas_call(
        _norm_matmul_kernel,
        out_shape=jax.ShapeDtypeStruct((m, n), x.dtype),
        grid=(m // tm, n // tn),
        in_specs=[pl.BlockSpec((tm, d), lambda i, j: (i, 0)),
                  pl.BlockSpec((1, d), lambda i, j: (0, 0)),
                  pl.BlockSpec((d, tn), lambda i, j: (0, j))],
        out_specs=pl.BlockSpec((tm, tn), lambda i, j: (i, j)),
        compiler_params=pltpu.CompilerParams(
            dimension_semantics=("parallel", "parallel")),
    )(x, norm_w.reshape(1, d), w)


def _norm_matmul_t_kernel(x_ref, g_ref, w_ref, o_ref):
    """out = rmsnorm(x) @ w_tile.T  (lm_head: vocab-tiled, no emb.T in HBM)."""
    x = x_ref[...].astype(jnp.float32)
    var = jnp.mean(x * x, axis=-1, keepdims=True)
    xn = (x * jax.lax.rsqrt(var + EPS)
          * (1.0 + g_ref[...].astype(jnp.float32))).astype(w_ref.dtype)
    o_ref[...] = jnp.dot(xn, w_ref[...].T,
                         preferred_element_type=jnp.float32).astype(o_ref.dtype)


def norm_matmul_transposed(x, norm_w, w_t, out_dtype=jnp.float32):
    """x: (M, D), w_t: (N, D) (tied embedding) -> (M, N), tiled over N (vocab)."""
    m, d = x.shape
    n = w_t.shape[0]
    tm = _pick_tile(m, 256)
    tn = _pick_tile(n, 512)          # lane-dense vocab tile (128-multiple at real size)
    return pl.pallas_call(
        _norm_matmul_t_kernel,
        out_shape=jax.ShapeDtypeStruct((m, n), out_dtype),
        grid=(m // tm, n // tn),
        in_specs=[pl.BlockSpec((tm, d), lambda i, j: (i, 0)),
                  pl.BlockSpec((1, d), lambda i, j: (0, 0)),
                  pl.BlockSpec((tn, d), lambda i, j: (j, 0))],
        out_specs=pl.BlockSpec((tm, tn), lambda i, j: (i, j)),
        compiler_params=pltpu.CompilerParams(
            dimension_semantics=("parallel", "parallel")),
    )(x, norm_w.reshape(1, d), w_t)


def _matmul_norm_residual_kernel(a_ref, w_ref, g_ref, r_ref, o_ref, acc_ref):
    """out = residual + rmsnorm(a @ w)  with K-tiled f32 accumulation."""
    k = pl.program_id(1)

    @pl.when(k == 0)
    def _():
        acc_ref[...] = jnp.zeros_like(acc_ref)

    acc_ref[...] += jnp.dot(a_ref[...], w_ref[...],
                            preferred_element_type=jnp.float32)

    @pl.when(k == pl.num_programs(1) - 1)
    def _():
        y = acc_ref[...]
        var = jnp.mean(y * y, axis=-1, keepdims=True)
        yn = y * jax.lax.rsqrt(var + EPS) * (1.0 + g_ref[...].astype(jnp.float32))
        o_ref[...] = (r_ref[...].astype(jnp.float32) + yn).astype(o_ref.dtype)


def matmul_norm_residual(a, w, norm_w, residual):
    """a: (M, K), w: (K, D), residual: (M, D) -> (M, D)."""
    m, k = a.shape
    d = w.shape[1]
    tm = _pick_tile(m, 256)
    tk = _pick_tile(k, 512)
    return pl.pallas_call(
        _matmul_norm_residual_kernel,
        out_shape=jax.ShapeDtypeStruct((m, d), a.dtype),
        grid=(m // tm, k // tk),
        in_specs=[pl.BlockSpec((tm, tk), lambda i, kk: (i, kk)),
                  pl.BlockSpec((tk, d), lambda i, kk: (kk, 0)),
                  pl.BlockSpec((1, d), lambda i, kk: (0, 0)),
                  pl.BlockSpec((tm, d), lambda i, kk: (i, 0))],
        out_specs=pl.BlockSpec((tm, d), lambda i, kk: (i, 0)),
        scratch_shapes=[pltpu.VMEM((tm, d), jnp.float32)],
        compiler_params=pltpu.CompilerParams(
            dimension_semantics=("parallel", "arbitrary")),
    )(a, w, norm_w.reshape(1, d), residual)


def _ffn_kernel(x_ref, gpre_ref, wg_ref, wu_ref, wd_ref, gpost_ref, o_ref,
                xn_sc, acc_sc):
    """out = x + rmsnorm_post( down( gelu(gate(xn)) * up(xn) ) ), xn = rmsnorm_pre(x).

    Tiled over the intermediate dim (grid axis 1) with a resident f32 accumulator.
    """
    j = pl.program_id(1)

    @pl.when(j == 0)
    def _():
        x = x_ref[...].astype(jnp.float32)
        var = jnp.mean(x * x, axis=-1, keepdims=True)
        xn = x * jax.lax.rsqrt(var + EPS) * (1.0 + gpre_ref[...].astype(jnp.float32))
        xn_sc[...] = xn.astype(xn_sc.dtype)
        acc_sc[...] = jnp.zeros_like(acc_sc)

    xn = xn_sc[...]
    g = jnp.dot(xn, wg_ref[...], preferred_element_type=jnp.float32)
    u = jnp.dot(xn, wu_ref[...], preferred_element_type=jnp.float32)
    h = jax.nn.gelu(g, approximate=True) * u          # GELU_TANH gating
    acc_sc[...] += jnp.dot(h.astype(wd_ref.dtype), wd_ref[...],
                           preferred_element_type=jnp.float32)

    @pl.when(j == pl.num_programs(1) - 1)
    def _():
        y = acc_sc[...]
        var = jnp.mean(y * y, axis=-1, keepdims=True)
        yn = y * jax.lax.rsqrt(var + EPS) * (1.0 + gpost_ref[...].astype(jnp.float32))
        o_ref[...] = (x_ref[...].astype(jnp.float32) + yn).astype(o_ref.dtype)


def gated_ffn(x, pre_norm_w, wg, wu, wd, post_norm_w):
    m, d = x.shape
    inter = wg.shape[1]
    tm = _pick_tile(m, 256)
    ti = _pick_tile(inter, 512)       # on v7x (64 MiB VMEM) keep ti <= 512
    return pl.pallas_call(
        _ffn_kernel,
        out_shape=jax.ShapeDtypeStruct((m, d), x.dtype),
        grid=(m // tm, inter // ti),
        in_specs=[pl.BlockSpec((tm, d), lambda i, j: (i, 0)),
                  pl.BlockSpec((1, d), lambda i, j: (0, 0)),
                  pl.BlockSpec((d, ti), lambda i, j: (0, j)),
                  pl.BlockSpec((d, ti), lambda i, j: (0, j)),
                  pl.BlockSpec((ti, d), lambda i, j: (j, 0)),
                  pl.BlockSpec((1, d), lambda i, j: (0, 0))],
        out_specs=pl.BlockSpec((tm, d), lambda i, j: (i, 0)),
        scratch_shapes=[pltpu.VMEM((tm, d), x.dtype),
                        pltpu.VMEM((tm, d), jnp.float32)],
        compiler_params=pltpu.CompilerParams(
            dimension_semantics=("parallel", "arbitrary")),
    )(x, pre_norm_w.reshape(1, d), wg, wu, wd, post_norm_w.reshape(1, d))


def _attn_kernel(pos_ref, q_ref, k_ref, v_ref, o_ref, m_sc, l_sc, acc_sc,
                 *, scale, window):
    """Flash-style attention for one (batch, kv_head) GQA group over one KV tile.

    The causal (+ optional sliding-window) mask is built in-kernel from iota and
    the (T,1) query-position column; the GQA group's query heads are stacked
    into a (group*T, Dh) tile so the MXU sees a larger M dimension.
    """
    si = pl.program_id(2)
    group, t, dh = q_ref.shape
    s_blk = k_ref.shape[0]
    gt = group * t

    @pl.when(si == 0)
    def _():
        m_sc[...] = jnp.full_like(m_sc, MASK_VALUE)
        l_sc[...] = jnp.zeros_like(l_sc)
        acc_sc[...] = jnp.zeros_like(acc_sc)

    q = q_ref[...].reshape(gt, dh)
    q = (q.astype(jnp.float32) * scale).astype(q_ref.dtype)   # fold scale into q
    s = jnp.dot(q, k_ref[...].T, preferred_element_type=jnp.float32)  # (gt, s_blk)

    # In-kernel mask: causal (+ sliding window for local layers).
    qpos = pos_ref[...].astype(jnp.int32)                              # (t, 1)
    kpos = si * s_blk + jax.lax.broadcasted_iota(jnp.int32, (t, s_blk), 1)
    ok = kpos <= qpos
    if window is not None:
        ok = ok & (kpos > qpos - window) & (kpos < qpos + window)
    mask = jnp.where(ok, 0.0, MASK_VALUE).astype(jnp.float32)          # (t, s_blk)
    s = s + jnp.tile(mask, (group, 1))                                 # (gt, s_blk)

    m_prev = m_sc[...]
    m_new = jnp.maximum(m_prev, jnp.max(s, axis=-1, keepdims=True))
    alpha = jnp.exp(m_prev - m_new)
    p = jnp.exp(s - m_new)
    l_sc[...] = alpha * l_sc[...] + jnp.sum(p, axis=-1, keepdims=True)
    acc_sc[...] = alpha * acc_sc[...] + jnp.dot(
        p.astype(v_ref.dtype), v_ref[...], preferred_element_type=jnp.float32)
    m_sc[...] = m_new

    @pl.when(si == pl.num_programs(2) - 1)
    def _():
        out = acc_sc[...] * pl.reciprocal(l_sc[...], approx=True)
        o_ref[...] = out.reshape(group, t, dh).astype(o_ref.dtype)


def mha(q, k_cache, v_cache, pos_col, scale, window):
    """q: (B,H,T,Dh); k/v cache: (B,KH,S,Dh); pos_col: (T,1) int32 -> (B,H,T,Dh)."""
    b, h, t, dh = q.shape
    _, kh, s, _ = k_cache.shape
    group = h // kh
    tk = _pick_tile(s, 512)
    kernel = functools.partial(_attn_kernel, scale=scale, window=window)
    return pl.pallas_call(
        kernel,
        out_shape=jax.ShapeDtypeStruct((b, h, t, dh), q.dtype),
        grid=(b, kh, s // tk),
        in_specs=[
            pl.BlockSpec((t, 1), lambda bi, ki, si: (0, 0)),
            pl.BlockSpec((None, group, t, dh), lambda bi, ki, si: (bi, ki, 0, 0)),
            pl.BlockSpec((None, None, tk, dh), lambda bi, ki, si: (bi, ki, si, 0)),
            pl.BlockSpec((None, None, tk, dh), lambda bi, ki, si: (bi, ki, si, 0)),
        ],
        out_specs=pl.BlockSpec((None, group, t, dh),
                               lambda bi, ki, si: (bi, ki, 0, 0)),
        scratch_shapes=[pltpu.VMEM((group * t, 1), jnp.float32),
                        pltpu.VMEM((group * t, 1), jnp.float32),
                        pltpu.VMEM((group * t, dh), jnp.float32)],
        compiler_params=pltpu.CompilerParams(
            dimension_semantics=("parallel", "parallel", "arbitrary")),
    )(pos_col, q, k_cache, v_cache)


# ------------------------------ plain-JAX glue ------------------------------


def build_rope(input_pos, head_dim, base):
    d2 = head_dim // 2
    freqs = 1.0 / (base ** (jnp.arange(0, d2, dtype=jnp.float32) * 2.0 / head_dim))
    angles = input_pos.astype(jnp.float32)[:, None] * freqs[None, :]    # (T, d2)
    return jnp.cos(angles), jnp.sin(angles)


def apply_rope(x, cos, sin):
    # x: (B, T, Hx, Dh) f32; half-split rotation (matches rotary_pos_emb.apply_rope).
    d2 = x.shape[-1] // 2
    x1, x2 = x[..., :d2], x[..., d2:]
    c = cos[None, :, None, :]
    s = sin[None, :, None, :]
    return jnp.concatenate([x1 * c - x2 * s, x2 * c + x1 * s], axis=-1)


def per_head_rmsnorm(x, w):
    # TODO(synk): could be fused into the qkv-projection kernel epilogue; left as
    # plain-JAX elementwise glue (Dh=8 last dim is too lane-starved for its own kernel).
    xf = x.astype(jnp.float32)
    var = jnp.mean(xf * xf, axis=-1, keepdims=True)
    return xf * jax.lax.rsqrt(var + EPS) * (1.0 + w.astype(jnp.float32))


def decoder_block(x, p, rope, pos_col, pos0, k_caches, v_caches, layer, window, cfg):
    """Gemma3 DecoderBlock: post-attn norm applied before the residual add."""
    B, T, D = x.shape
    H, KH, Dh = cfg["num_heads"], cfg["num_kv_heads"], cfg["head_dim"]
    x2d = x.reshape(B * T, D)

    # pre-attention RMSNorm fused into the QKV projection
    qkv = norm_matmul(x2d, p["pre_atten_norm"], p["w_qkv"])
    qkv = qkv.reshape(B, T, H + 2 * KH, Dh)
    q, k, v = qkv[:, :, :H], qkv[:, :, H:H + KH], qkv[:, :, H + KH:]

    # Gemma3 per-head query/key RMSNorm, then RoPE (f32, then back to bf16).
    cos, sin = rope
    q = apply_rope(per_head_rmsnorm(q, p["q_norm"]), cos, sin).astype(x.dtype)
    k = apply_rope(per_head_rmsnorm(k, p["k_norm"]), cos, sin).astype(x.dtype)

    # KV-cache scatter with a traced position (contiguous prefill from pos0);
    # the stacked caches are donated at the jit boundary so this is in place.
    k_t = k.transpose(0, 2, 1, 3).astype(k_caches.dtype)   # (B, KH, T, Dh)
    v_t = v.transpose(0, 2, 1, 3).astype(v_caches.dtype)
    k_caches = jax.lax.dynamic_update_slice(k_caches, k_t[None], (layer, 0, 0, pos0, 0))
    v_caches = jax.lax.dynamic_update_slice(v_caches, v_t[None], (layer, 0, 0, pos0, 0))

    # TODO(synk): attention scale uses head_dim**-0.5 in place of a configured
    # query_pre_attn_scalar.
    scale = float(Dh) ** -0.5
    qh = q.transpose(0, 2, 1, 3)                            # (B, H, T, Dh)
    attn = mha(qh, k_caches[layer], v_caches[layer], pos_col, scale, window)
    attn2d = attn.transpose(0, 2, 1, 3).reshape(B * T, H * Dh)

    # W_o matmul with fused post-attention norm + residual (norm BEFORE residual)
    x2d = matmul_norm_residual(attn2d, p["w_o"], p["post_atten_norm"], x2d)

    # fused gated FFN (pre-norm, gate/up, gelu, down, post-norm, residual)
    out2d = gated_ffn(x2d, p["pre_ff_norm"], p["w_gate"], p["w_up"], p["w_down"],
                      p["post_ff_norm"])
    return out2d.reshape(B, T, D), k_caches, v_caches


def decoder_forward(tokens, input_pos, k_caches, v_caches, params, cfg):
    D = cfg["embedding_dim"]
    L = cfg["num_layers"]
    B, T = tokens.shape

    # token embedding (padding_idx=0 row is zero) + embedding scale sqrt(D)
    x = (params["emb"][tokens].astype(jnp.float32) * math.sqrt(D)).astype(ACT_DTYPE)

    pos_col = input_pos.reshape(T, 1).astype(jnp.int32)
    pos0 = input_pos[0]

    for l in range(L):
        window = (cfg["sliding_window_size"]
                  if cfg["attn_types"][l] == "local" else None)
        rope = build_rope(input_pos, cfg["head_dim"], cfg["rotary_bases"][l])
        x, k_caches, v_caches = decoder_block(
            x, params["layers"][l], rope, pos_col, pos0,
            k_caches, v_caches, l, window, cfg)

    # final RMSNorm fused into the (vocab-tiled, weight-tied) lm_head matmul
    logits = norm_matmul_transposed(x.reshape(B * T, D), params["final_norm"],
                                    params["emb"], out_dtype=jnp.float32)
    return logits.reshape(B, T, cfg["vocab_size"]), k_caches, v_caches
    # TODO(synk): export_config / pixel_mask (multimodal image indices) paths are
    # not exercised.


# ----------------------------------- main -----------------------------------

if __name__ == "__main__":
    warnings.filterwarnings("ignore", message=".*donat.*")  # benign if XLA copies

    VOCAB, D, L = 256, 32, 2
    H, KH, Dh = 4, 1, 8
    INTER = 64
    KV_MAX = 16
    B, T = 2, 8
    WINDOW = 4

    cfg = dict(vocab_size=VOCAB, embedding_dim=D, num_layers=L,
               num_heads=H, num_kv_heads=KH, head_dim=Dh,
               kv_cache_max=KV_MAX, sliding_window_size=WINDOW,
               # Gemma3 interleaves local-sliding and global attention layers.
               attn_types=["local", "global"],
               rotary_bases=[10000.0, 1000000.0])

    key = jax.random.PRNGKey(0)
    keys = iter(jax.random.split(key, 128))

    def nrm(shape, scale=0.02):
        return (jax.random.normal(next(keys), shape, jnp.float32) * scale
                ).astype(PARAM_DTYPE)

    emb = nrm((VOCAB, D), 1.0).at[0].set(0.0)   # padding_idx=0 -> zero row

    layers = []
    for _ in range(L):
        layers.append(dict(
            pre_atten_norm=nrm((D,), 0.1),
            post_atten_norm=nrm((D,), 0.1),
            pre_ff_norm=nrm((D,), 0.1),
            post_ff_norm=nrm((D,), 0.1),
            q_norm=nrm((Dh,), 0.1),
            k_norm=nrm((Dh,), 0.1),
            w_qkv=nrm((D, (H + 2 * KH) * Dh)),
            w_o=nrm((H * Dh, D)),
            w_gate=nrm((D, INTER)),
            w_up=nrm((D, INTER)),
            w_down=nrm((INTER, D)),
        ))
    params = dict(emb=emb, layers=layers, final_norm=nrm((D,), 0.1))

    tokens = jax.random.randint(next(keys), (B, T), 0, VOCAB, dtype=jnp.int32)
    input_pos = jnp.arange(T, dtype=jnp.int32)
    # KV caches stored head-major (L, B, KH, S, Dh) so attention reads them directly.
    k_caches = jnp.zeros((L, B, KH, KV_MAX, Dh), ACT_DTYPE)
    v_caches = jnp.zeros((L, B, KH, KV_MAX, Dh), ACT_DTYPE)

    fwd = jax.jit(functools.partial(decoder_forward, cfg=cfg),
                  donate_argnums=(2, 3))   # in-place KV cache update
    logits, new_k, new_v = fwd(tokens, input_pos, k_caches, v_caches, params)
    jax.block_until_ready((logits, new_k, new_v))

    assert logits.shape == (B, T, VOCAB)
    assert new_k.shape == (L, B, KH, KV_MAX, Dh)
    assert bool(jnp.all(jnp.isfinite(logits)))
    print("KERNEL_OK")
</pallas_src>

<mosaic_0001>
module attributes {stable_mosaic.version = 11 : i64} {
  func.func @_norm_matmul_kernel(%arg0: i32, %arg1: i32, %arg2: memref<16x32xbf16, #tpu.memory_space<vmem>>, %arg3: memref<1x32xbf16, #tpu.memory_space<vmem>>, %arg4: memref<32x48xbf16, #tpu.memory_space<vmem>>, %arg5: memref<16x48xbf16, #tpu.memory_space<vmem>>) attributes {dimension_semantics = [#tpu.dimension_semantics<parallel>, #tpu.dimension_semantics<parallel>], iteration_bounds = array<i64: 1, 1>, scalar_prefetch = 0 : i64, scratch_operands = 0 : i64, tpu.core_type = #tpu.core_type<tc>, window_params = [{transform_indices = @transform_0, window_bounds = array<i64: 16, 32>}, {pipeline_mode = #tpu.pipeline_mode<synchronous>, transform_indices = @transform_1, window_bounds = array<i64: 1, 32>}, {transform_indices = @transform_2, window_bounds = array<i64: 32, 48>}, {transform_indices = @transform_3, window_bounds = array<i64: 16, 48>}]} {
    %c0 = arith.constant 0 : index
    %c0_0 = arith.constant 0 : index
    %0 = vector.load %arg2[%c0, %c0_0] : memref<16x32xbf16, #tpu.memory_space<vmem>>, vector<16x32xbf16>
    %1 = arith.extf %0 : vector<16x32xbf16> to vector<16x32xf32>
    %2 = arith.mulf %1, %1 : vector<16x32xf32>
    %cst = arith.constant dense<0.000000e+00> : vector<16xf32>
    %3 = vector.multi_reduction <add>, %2, %cst [1] : vector<16x32xf32> to vector<16xf32>
    %4 = vector.shape_cast %3 : vector<16xf32> to vector<16x1xf32>
    %cst_1 = arith.constant 3.200000e+01 : f32
    %5 = vector.broadcast %cst_1 : f32 to vector<16x1xf32>
    %6 = arith.divf %4, %5 : vector<16x1xf32>
    %cst_2 = arith.constant 9.99999997E-7 : f32
    %7 = vector.broadcast %cst_2 : f32 to vector<16x1xf32>
    %8 = arith.addf %6, %7 : vector<16x1xf32>
    %9 = math.rsqrt %8 : vector<16x1xf32>
    %10 = vector.broadcast %9 : vector<16x1xf32> to vector<16x32xf32>
    %11 = arith.mulf %1, %10 : vector<16x32xf32>
    %c0_3 = arith.constant 0 : index
    %c0_4 = arith.constant 0 : index
    %12 = vector.load %arg3[%c0_3, %c0_4] : memref<1x32xbf16, #tpu.memory_space<vmem>>, vector<1x32xbf16>
    %13 = arith.extf %12 : vector<1x32xbf16> to vector<1x32xf32>
    %cst_5 = arith.constant 1.000000e+00 : f32
    %14 = vector.broadcast %cst_5 : f32 to vector<1x32xf32>
    %15 = arith.addf %14, %13 : vector<1x32xf32>
    %16 = vector.broadcast %15 : vector<1x32xf32> to vector<16x32xf32>
    %17 = arith.mulf %11, %16 : vector<16x32xf32>
    %18 = arith.truncf %17 : vector<16x32xf32> to vector<16x32xbf16>
    %c0_6 = arith.constant 0 : index
    %c0_7 = arith.constant 0 : index
    %19 = vector.load %arg4[%c0_6, %c0_7] : memref<32x48xbf16, #tpu.memory_space<vmem>>, vector<32x48xbf16>
    %cst_8 = arith.constant dense<0.000000e+00> : vector<16x48xf32>
    %20 = tpu.matmul %18, %19, %cst_8 {dimension_numbers = #tpu.dot_dimension_numbers<[1], [0], [0], [1], [0, 0, 1, 1], [], []>} : vector<16x32xbf16>, vector<32x48xbf16>, vector<16x48xf32> -> vector<16x48xf32>
    %21 = arith.truncf %20 : vector<16x48xf32> to vector<16x48xbf16>
    %c0_9 = arith.constant 0 : index
    %c0_10 = arith.constant 0 : index
    %22 = vector.load %arg5[%c0_9, %c0_10] : memref<16x48xbf16, #tpu.memory_space<vmem>>, vector<16x48xbf16>
    tpu.vector_store %arg5[%c0_9, %c0_10], %21 {strides = array<i32>} : memref<16x48xbf16, #tpu.memory_space<vmem>>, vector<16x48xbf16>,
    return
  }
  func.func @transform_0(%arg0: i32, %arg1: i32) -> (i32, i32) {
    %c0_i32 = arith.constant 0 : i32
    %c0_i32_0 = arith.constant 0 : i32
    return %arg0, %c0_i32 : i32, i32
  }
  func.func @transform_1(%arg0: i32, %arg1: i32) -> (i32, i32) {
    %c0_i32 = arith.constant 0 : i32
    %c0_i32_0 = arith.constant 0 : i32
    %c0_i32_1 = arith.constant 0 : i32
    return %c0_i32, %c0_i32_0 : i32, i32
  }
  func.func @transform_2(%arg0: i32, %arg1: i32) -> (i32, i32) {
    %c0_i32 = arith.constant 0 : i32
    %c0_i32_0 = arith.constant 0 : i32
    return %c0_i32, %arg1 : i32, i32
  }
  func.func @transform_3(%arg0: i32, %arg1: i32) -> (i32, i32) {
    %c0_i32 = arith.constant 0 : i32
    return %arg0, %arg1 : i32, i32
  }
}

module attributes {stable_mosaic.version = 11 : i64} {
  func.func @_attn_kernel(%arg0: i32, %arg1: i32, %arg2: i32, %arg3: memref<8x1xi32, #tpu.memory_space<vmem>>, %arg4: memref<1x4x8x8xbf16, #tpu.memory_space<vmem>>, %arg5: memref<1x1x16x8xbf16, #tpu.memory_space<vmem>>, %arg6: memref<1x1x16x8xbf16, #tpu.memory_space<vmem>>, %arg7: memref<1x4x8x8xbf16, #tpu.memory_space<vmem>>, %arg8: memref<32x1xf32, #tpu.memory_space<vmem>>, %arg9: memref<32x1xf32, #tpu.memory_space<vmem>>, %arg10: memref<32x8xf32, #tpu.memory_space<vmem>>) attributes {dimension_semantics = [#tpu.dimension_semantics<parallel>, #tpu.dimension_semantics<parallel>, #tpu.dimension_semantics<arbitrary>], iteration_bounds = array<i64: 2, 1, 1>, scalar_prefetch = 0 : i64, scratch_operands = 3 : i64, tpu.core_type = #tpu.core_type<tc>, window_params = [{pipeline_mode = #tpu.pipeline_mode<synchronous>, transform_indices = @transform_0, window_bounds = array<i64: 8, 1>}, {transform_indices = @transform_1, window_bounds = array<i64: 1, 4, 8, 8>}, {transform_indices = @transform_2, window_bounds = array<i64: 1, 1, 16, 8>}, {transform_indices = @transform_3, window_bounds = array<i64: 1, 1, 16, 8>}, {transform_indices = @transform_4, window_bounds = array<i64: 1, 4, 8, 8>}]} {
    %c0_i32 = arith.constant 0 : i32
    %0 = arith.cmpi eq, %arg2, %c0_i32 : i32
    %1 = arith.extui %0 : i1 to i32
    %c0_i32_0 = arith.constant 0 : i32
    %2 = arith.cmpi ne, %1, %c0_i32_0 : i32
    scf.if %2 {
      %cst_35 = arith.constant -2.38197633E+38 : f32
      %64 = vector.broadcast %cst_35 : f32 to vector<32x1xf32>
      %c0_36 = arith.constant 0 : index
      %c0_37 = arith.constant 0 : index
      %65 = vector.load %arg8[%c0_36, %c0_37] : memref<32x1xf32, #tpu.memory_space<vmem>>, vector<32x1xf32>
      tpu.vector_store %arg8[%c0_36, %c0_37], %64 {strides = array<i32>} : memref<32x1xf32, #tpu.memory_space<vmem>>, vector<32x1xf32>,
      %cst_38 = arith.constant 0.000000e+00 : f32
      %66 = vector.broadcast %cst_38 : f32 to vector<32x1xf32>
      %c0_39 = arith.constant 0 : index
      %c0_40 = arith.constant 0 : index
      %67 = vector.load %arg9[%c0_39, %c0_40] : memref<32x1xf32, #tpu.memory_space<vmem>>, vector<32x1xf32>
      tpu.vector_store %arg9[%c0_39, %c0_40], %66 {strides = array<i32>} : memref<32x1xf32, #tpu.memory_space<vmem>>, vector<32x1xf32>,
      %cst_41 = arith.constant 0.000000e+00 : f32
      %68 = vector.broadcast %cst_41 : f32 to vector<32x8xf32>
      %c0_42 = arith.constant 0 : index
      %c0_43 = arith.constant 0 : index
      %69 = vector.load %arg10[%c0_42, %c0_43] : memref<32x8xf32, #tpu.memory_space<vmem>>, vector<32x8xf32>
      tpu.vector_store %arg10[%c0_42, %c0_43], %68 {strides = array<i32>} : memref<32x8xf32, #tpu.memory_space<vmem>>, vector<32x8xf32>,
    } else {
    }
    %c0 = arith.constant 0 : index
    %c0_1 = arith.constant 0 : index
    %c0_2 = arith.constant 0 : index
    %c0_3 = arith.constant 0 : index
    %3 = vector.load %arg4[%c0, %c0_1, %c0_2, %c0_3] : memref<1x4x8x8xbf16, #tpu.memory_space<vmem>>, vector<1x4x8x8xbf16>
    %4 = vector.shape_cast %3 : vector<1x4x8x8xbf16> to vector<4x8x8xbf16>
    %5 = vector.shape_cast %4 : vector<4x8x8xbf16> to vector<32x8xbf16>
    %6 = arith.extf %5 : vector<32x8xbf16> to vector<32x8xf32>
    %cst = arith.constant 0.353553385 : f32
    %7 = vector.broadcast %cst : f32 to vector<32x8xf32>
    %8 = arith.mulf %6, %7 : vector<32x8xf32>
    %9 = arith.truncf %8 : vector<32x8xf32> to vector<32x8xbf16>
    %c0_4 = arith.constant 0 : index
    %c0_5 = arith.constant 0 : index
    %c0_6 = arith.constant 0 : index
    %c0_7 = arith.constant 0 : index
    %10 = vector.load %arg5[%c0_4, %c0_5, %c0_6, %c0_7] : memref<1x1x16x8xbf16, #tpu.memory_space<vmem>>, vector<1x1x16x8xbf16>
    %11 = vector.shape_cast %10 : vector<1x1x16x8xbf16> to vector<16x8xbf16>
    %12 = tpu.transpose %11, [1, 0] : vector<16x8xbf16> -> vector<8x16xbf16>
    %cst_8 = arith.constant dense<0.000000e+00> : vector<32x16xf32>
    %13 = tpu.matmul %9, %12, %cst_8 {dimension_numbers = #tpu.dot_dimension_numbers<[1], [0], [0], [1], [0, 0, 1, 1], [], []>} : vector<32x8xbf16>, vector<8x16xbf16>, vector<32x16xf32> -> vector<32x16xf32>
    %c0_9 = arith.constant 0 : index
    %c0_10 = arith.constant 0 : index
    %14 = vector.load %arg3[%c0_9, %c0_10] : memref<8x1xi32, #tpu.memory_space<vmem>>, vector<8x1xi32>
    %c16_i32 = arith.constant 16 : i32
    %15 = arith.muli %arg2, %c16_i32 : i32
    %16 = tpu.iota {dimensions = array<i32: 1>} : vector<8x16xi32>
    %17 = vector.broadcast %15 : i32 to vector<8x16xi32>
    %18 = arith.addi %17, %16 : vector<8x16xi32>
    %19 = vector.broadcast %14 : vector<8x1xi32> to vector<8x16xi32>
    %20 = arith.cmpi sle, %18, %19 : vector<8x16xi32>
    %c4_i32 = arith.constant 4 : i32
    %21 = vector.broadcast %c4_i32 : i32 to vector<8x1xi32>
    %22 = arith.subi %14, %21 : vector<8x1xi32>
    %23 = vector.broadcast %22 : vector<8x1xi32> to vector<8x16xi32>
    %24 = arith.cmpi sgt, %18, %23 : vector<8x16xi32>
    %25 = arith.andi %20, %24 : vector<8x16xi1>
    %c4_i32_11 = arith.constant 4 : i32
    %26 = vector.broadcast %c4_i32_11 : i32 to vector<8x1xi32>
    %27 = arith.addi %14, %26 : vector<8x1xi32>
    %28 = vector.broadcast %27 : vector<8x1xi32> to vector<8x16xi32>
    %29 = arith.cmpi slt, %18, %28 : vector<8x16xi32>
    %30 = arith.andi %25, %29 : vector<8x16xi1>
    %cst_12 = arith.constant 0.000000e+00 : f32
    %cst_13 = arith.constant -2.38197633E+38 : f32
    %31 = vector.broadcast %cst_12 : f32 to vector<8x16xf32>
    %32 = vector.broadcast %cst_13 : f32 to vector<8x16xf32>
    %33 = arith.select %30, %31, %32 : vector<8x16xi1>, vector<8x16xf32>
    %34 = tpu.concatenate %33, %33, %33, %33 in 0 : vector<8x16xf32>, vector<8x16xf32>, vector<8x16xf32>, vector<8x16xf32> -> vector<32x16xf32>
    %35 = arith.addf %13, %34 : vector<32x16xf32>
    %c0_14 = arith.constant 0 : index
    %c0_15 = arith.constant 0 : index
    %36 = vector.load %arg8[%c0_14, %c0_15] : memref<32x1xf32, #tpu.memory_space<vmem>>, vector<32x1xf32>
    %cst_16 = arith.constant dense<0xFF800000> : vector<32xf32>
    %37 = vector.multi_reduction <maximumf>, %35, %cst_16 [1] : vector<32x16xf32> to vector<32xf32>
    %38 = vector.shape_cast %37 : vector<32xf32> to vector<32x1xf32>
    %39 = arith.maximumf %36, %38 : vector<32x1xf32>
    %40 = arith.subf %36, %39 : vector<32x1xf32>
    %41 = math.exp %40 : vector<32x1xf32>
    %42 = vector.broadcast %39 : vector<32x1xf32> to vector<32x16xf32>
    %43 = arith.subf %35, %42 : vector<32x16xf32>
    %44 = math.exp %43 : vector<32x16xf32>
    %c0_17 = arith.constant 0 : index
    %c0_18 = arith.constant 0 : index
    %45 = vector.load %arg9[%c0_17, %c0_18] : memref<32x1xf32, #tpu.memory_space<vmem>>, vector<32x1xf32>
    %46 = arith.mulf %41, %45 : vector<32x1xf32>
    %cst_19 = arith.constant dense<0.000000e+00> : vector<32xf32>
    %47 = vector.multi_reduction <add>, %44, %cst_19 [1] : vector<32x16xf32> to vector<32xf32>
    %48 = vector.shape_cast %47 : vector<32xf32> to vector<32x1xf32>
    %49 = arith.addf %46, %48 : vector<32x1xf32>
    %c0_20 = arith.constant 0 : index
    %c0_21 = arith.constant 0 : index
    %50 = vector.load %arg9[%c0_20, %c0_21] : memref<32x1xf32, #tpu.memory_space<vmem>>, vector<32x1xf32>
    tpu.vector_store %arg9[%c0_20, %c0_21], %49 {strides = array<i32>} : memref<32x1xf32, #tpu.memory_space<vmem>>, vector<32x1xf32>,
    %c0_22 = arith.constant 0 : index
    %c0_23 = arith.constant 0 : index
    %51 = vector.load %arg10[%c0_22, %c0_23] : memref<32x8xf32, #tpu.memory_space<vmem>>, vector<32x8xf32>
    %52 = vector.broadcast %41 : vector<32x1xf32> to vector<32x8xf32>
    %53 = arith.mulf %52, %51 : vector<32x8xf32>
    %54 = arith.truncf %44 : vector<32x16xf32> to vector<32x16xbf16>
    %c0_24 = arith.constant 0 : index
    %c0_25 = arith.constant 0 : index
    %c0_26 = arith.constant 0 : index
    %c0_27 = arith.constant 0 : index
    %55 = vector.load %arg6[%c0_24, %c0_25, %c0_26, %c0_27] : memref<1x1x16x8xbf16, #tpu.memory_space<vmem>>, vector<1x1x16x8xbf16>
    %56 = vector.shape_cast %55 : vector<1x1x16x8xbf16> to vector<16x8xbf16>
    %cst_28 = arith.constant dense<0.000000e+00> : vector<32x8xf32>
    %57 = tpu.matmul %54, %56, %cst_28 {dimension_numbers = #tpu.dot_dimension_numbers<[1], [0], [0], [1], [0, 0, 1, 1], [], []>} : vector<32x16xbf16>, vector<16x8xbf16>, vector<32x8xf32> -> vector<32x8xf32>
    %58 = arith.addf %53, %57 : vector<32x8xf32>
    %c0_29 = arith.constant 0 : index
    %c0_30 = arith.constant 0 : index
    %59 = vector.load %arg10[%c0_29, %c0_30] : memref<32x8xf32, #tpu.memory_space<vmem>>, vector<32x8xf32>
    tpu.vector_store %arg10[%c0_29, %c0_30], %58 {strides = array<i32>} : memref<32x8xf32, #tpu.memory_space<vmem>>, vector<32x8xf32>,
    %c0_31 = arith.constant 0 : index
    %c0_32 = arith.constant 0 : index
    %60 = vector.load %arg8[%c0_31, %c0_32] : memref<32x1xf32, #tpu.memory_space<vmem>>, vector<32x1xf32>
    tpu.vector_store %arg8[%c0_31, %c0_32], %39 {strides = array<i32>} : memref<32x1xf32, #tpu.memory_space<vmem>>, vector<32x1xf32>,
    %c0_i32_33 = arith.constant 0 : i32
    %61 = arith.cmpi eq, %arg2, %c0_i32_33 : i32
    %62 = arith.extui %61 : i1 to i32
    %c0_i32_34 = arith.constant 0 : i32
    %63 = arith.cmpi ne, %62, %c0_i32_34 : i32
    scf.if %63 {
      %c0_35 = arith.constant 0 : index
      %c0_36 = arith.constant 0 : index
      %64 = vector.load %arg10[%c0_35, %c0_36] : memref<32x8xf32, #tpu.memory_space<vmem>>, vector<32x8xf32>
      %c0_37 = arith.constant 0 : index
      %c0_38 = arith.constant 0 : index
      %65 = vector.load %arg9[%c0_37, %c0_38] : memref<32x1xf32, #tpu.memory_space<vmem>>, vector<32x1xf32>
      %66 = tpu.reciprocal %65 {approx = true} : vector<32x1xf32> -> vector<32x1xf32>
      %67 = vector.broadcast %66 : vector<32x1xf32> to vector<32x8xf32>
      %68 = arith.mulf %64, %67 : vector<32x8xf32>
      %69 = vector.shape_cast %68 : vector<32x8xf32> to vector<4x8x8xf32>
      %70 = arith.truncf %69 : vector<4x8x8xf32> to vector<4x8x8xbf16>
      %c0_39 = arith.constant 0 : index
      %c0_40 = arith.constant 0 : index
      %c0_41 = arith.constant 0 : index
      %c0_42 = arith.constant 0 : index
      %71 = vector.load %arg7[%c0_39, %c0_40, %c0_41, %c0_42] : memref<1x4x8x8xbf16, #tpu.memory_space<vmem>>, vector<1x4x8x8xbf16>
      %72 = vector.shape_cast %71 : vector<1x4x8x8xbf16> to vector<4x8x8xbf16>
      %73 = vector.shape_cast %70 : vector<4x8x8xbf16> to vector<1x4x8x8xbf16>
      tpu.vector_store %arg7[%c0_39, %c0_40, %c0_41, %c0_42], %73 {strides = array<i32>} : memref<1x4x8x8xbf16, #tpu.memory_space<vmem>>, vector<1x4x8x8xbf16>,
    } else {
    }
    return
  }
  func.func @transform_0(%arg0: i32, %arg1: i32, %arg2: i32) -> (i32, i32) {
    %c0_i32 = arith.constant 0 : i32
    %c0_i32_0 = arith.constant 0 : i32
    %c0_i32_1 = arith.constant 0 : i32
    return %c0_i32, %c0_i32_0 : i32, i32
  }
  func.func @transform_1(%arg0: i32, %arg1: i32, %arg2: i32) -> (i32, i32, i32, i32) {
    %c0_i32 = arith.constant 0 : i32
    %c0_i32_0 = arith.constant 0 : i32
    %c0_i32_1 = arith.constant 0 : i32
    return %arg0, %arg1, %c0_i32, %c0_i32_0 : i32, i32, i32, i32
  }
  func.func @transform_2(%arg0: i32, %arg1: i32, %arg2: i32) -> (i32, i32, i32, i32) {
    %c0_i32 = arith.constant 0 : i32
    %c0_i32_0 = arith.constant 0 : i32
    return %arg0, %arg1, %arg2, %c0_i32 : i32, i32, i32, i32
  }
  func.func @transform_3(%arg0: i32, %arg1: i32, %arg2: i32) -> (i32, i32, i32, i32) {
    %c0_i32 = arith.constant 0 : i32
    %c0_i32_0 = arith.constant 0 : i32
    return %arg0, %arg1, %arg2, %c0_i32 : i32, i32, i32, i32
  }
  func.func @transform_4(%arg0: i32, %arg1: i32, %arg2: i32) -> (i32, i32, i32, i32) {
    %c0_i32 = arith.constant 0 : i32
    %c0_i32_0 = arith.constant 0 : i32
    %c0_i32_1 = arith.constant 0 : i32
    return %arg0, %arg1, %c0_i32, %c0_i32_0 : i32, i32, i32, i32
  }
}

module attributes {stable_mosaic.version = 11 : i64} {
  func.func @_matmul_norm_residual_kernel(%arg0: i32, %arg1: i32, %arg2: memref<16x32xbf16, #tpu.memory_space<vmem>>, %arg3: memref<32x32xbf16, #tpu.memory_space<vmem>>, %arg4: memref<1x32xbf16, #tpu.memory_space<vmem>>, %arg5: memref<16x32xbf16, #tpu.memory_space<vmem>>, %arg6: memref<16x32xbf16, #tpu.memory_space<vmem>>, %arg7: memref<16x32xf32, #tpu.memory_space<vmem>>) attributes {dimension_semantics = [#tpu.dimension_semantics<parallel>, #tpu.dimension_semantics<arbitrary>], iteration_bounds = array<i64: 1, 1>, scalar_prefetch = 0 : i64, scratch_operands = 1 : i64, tpu.core_type = #tpu.core_type<tc>, window_params = [{transform_indices = @transform_0, window_bounds = array<i64: 16, 32>}, {transform_indices = @transform_1, window_bounds = array<i64: 32, 32>}, {pipeline_mode = #tpu.pipeline_mode<synchronous>, transform_indices = @transform_2, window_bounds = array<i64: 1, 32>}, {transform_indices = @transform_3, window_bounds = array<i64: 16, 32>}, {transform_indices = @transform_4, window_bounds = array<i64: 16, 32>}]} {
    %c0_i32 = arith.constant 0 : i32
    %0 = arith.cmpi eq, %arg1, %c0_i32 : i32
    %1 = arith.extui %0 : i1 to i32
    %c0_i32_0 = arith.constant 0 : i32
    %2 = arith.cmpi ne, %1, %c0_i32_0 : i32
    scf.if %2 {
      %cst_10 = arith.constant 0.000000e+00 : f32
      %12 = vector.broadcast %cst_10 : f32 to vector<16x32xf32>
      %c0_11 = arith.constant 0 : index
      %c0_12 = arith.constant 0 : index
      %13 = vector.load %arg7[%c0_11, %c0_12] : memref<16x32xf32, #tpu.memory_space<vmem>>, vector<16x32xf32>
      tpu.vector_store %arg7[%c0_11, %c0_12], %12 {strides = array<i32>} : memref<16x32xf32, #tpu.memory_space<vmem>>, vector<16x32xf32>,
    } else {
    }
    %c0 = arith.constant 0 : index
    %c0_1 = arith.constant 0 : index
    %3 = vector.load %arg7[%c0, %c0_1] : memref<16x32xf32, #tpu.memory_space<vmem>>, vector<16x32xf32>
    %c0_2 = arith.constant 0 : index
    %c0_3 = arith.constant 0 : index
    %4 = vector.load %arg2[%c0_2, %c0_3] : memref<16x32xbf16, #tpu.memory_space<vmem>>, vector<16x32xbf16>
    %c0_4 = arith.constant 0 : index
    %c0_5 = arith.constant 0 : index
    %5 = vector.load %arg3[%c0_4, %c0_5] : memref<32x32xbf16, #tpu.memory_space<vmem>>, vector<32x32xbf16>
    %cst = arith.constant dense<0.000000e+00> : vector<16x32xf32>
    %6 = tpu.matmul %4, %5, %cst {dimension_numbers = #tpu.dot_dimension_numbers<[1], [0], [0], [1], [0, 0, 1, 1], [], []>} : vector<16x32xbf16>, vector<32x32xbf16>, vector<16x32xf32> -> vector<16x32xf32>
    %7 = arith.addf %3, %6 : vector<16x32xf32>
    %c0_6 = arith.constant 0 : index
    %c0_7 = arith.constant 0 : index
    %8 = vector.load %arg7[%c0_6, %c0_7] : memref<16x32xf32, #tpu.memory_space<vmem>>, vector<16x32xf32>
    tpu.vector_store %arg7[%c0_6, %c0_7], %7 {strides = array<i32>} : memref<16x32xf32, #tpu.memory_space<vmem>>, vector<16x32xf32>,
    %c0_i32_8 = arith.constant 0 : i32
    %9 = arith.cmpi eq, %arg1, %c0_i32_8 : i32
    %10 = arith.extui %9 : i1 to i32
    %c0_i32_9 = arith.constant 0 : i32
    %11 = arith.cmpi ne, %10, %c0_i32_9 : i32
    scf.if %11 {
      %c0_10 = arith.constant 0 : index
      %c0_11 = arith.constant 0 : index
      %12 = vector.load %arg7[%c0_10, %c0_11] : memref<16x32xf32, #tpu.memory_space<vmem>>, vector<16x32xf32>
      %13 = arith.mulf %12, %12 : vector<16x32xf32>
      %cst_12 = arith.constant dense<0.000000e+00> : vector<16xf32>
      %14 = vector.multi_reduction <add>, %13, %cst_12 [1] : vector<16x32xf32> to vector<16xf32>
      %15 = vector.shape_cast %14 : vector<16xf32> to vector<16x1xf32>
      %cst_13 = arith.constant 3.200000e+01 : f32
      %16 = vector.broadcast %cst_13 : f32 to vector<16x1xf32>
      %17 = arith.divf %15, %16 : vector<16x1xf32>
      %cst_14 = arith.constant 9.99999997E-7 : f32
      %18 = vector.broadcast %cst_14 : f32 to vector<16x1xf32>
      %19 = arith.addf %17, %18 : vector<16x1xf32>
      %20 = math.rsqrt %19 : vector<16x1xf32>
      %21 = vector.broadcast %20 : vector<16x1xf32> to vector<16x32xf32>
      %22 = arith.mulf %12, %21 : vector<16x32xf32>
      %c0_15 = arith.constant 0 : index
      %c0_16 = arith.constant 0 : index
      %23 = vector.load %arg4[%c0_15, %c0_16] : memref<1x32xbf16, #tpu.memory_space<vmem>>, vector<1x32xbf16>
      %24 = arith.extf %23 : vector<1x32xbf16> to vector<1x32xf32>
      %cst_17 = arith.constant 1.000000e+00 : f32
      %25 = vector.broadcast %cst_17 : f32 to vector<1x32xf32>
      %26 = arith.addf %25, %24 : vector<1x32xf32>
      %27 = vector.broadcast %26 : vector<1x32xf32> to vector<16x32xf32>
      %28 = arith.mulf %22, %27 : vector<16x32xf32>
      %c0_18 = arith.constant 0 : index
      %c0_19 = arith.constant 0 : index
      %29 = vector.load %arg5[%c0_18, %c0_19] : memref<16x32xbf16, #tpu.memory_space<vmem>>, vector<16x32xbf16>
      %30 = arith.extf %29 : vector<16x32xbf16> to vector<16x32xf32>
      %31 = arith.addf %30, %28 : vector<16x32xf32>
      %32 = arith.truncf %31 : vector<16x32xf32> to vector<16x32xbf16>
      %c0_20 = arith.constant 0 : index
      %c0_21 = arith.constant 0 : index
      %33 = vector.load %arg6[%c0_20, %c0_21] : memref<16x32xbf16, #tpu.memory_space<vmem>>, vector<16x32xbf16>
      tpu.vector_store %arg6[%c0_20, %c0_21], %32 {strides = array<i32>} : memref<16x32xbf16, #tpu.memory_space<vmem>>, vector<16x32xbf16>,
    } else {
    }
    return
  }
  func.func @transform_0(%arg0: i32, %arg1: i32) -> (i32, i32) {
    %c0_i32 = arith.constant 0 : i32
    return %arg0, %arg1 : i32, i32
  }
  func.func @transform_1(%arg0: i32, %arg1: i32) -> (i32, i32) {
    %c0_i32 = arith.constant 0 : i32
    %c0_i32_0 = arith.constant 0 : i32
    return %arg1, %c0_i32 : i32, i32
  }
  func.func @transform_2(%arg0: i32, %arg1: i32) -> (i32, i32) {
    %c0_i32 = arith.constant 0 : i32
    %c0_i32_0 = arith.constant 0 : i32
    %c0_i32_1 = arith.constant 0 : i32
    return %c0_i32, %c0_i32_0 : i32, i32
  }
  func.func @transform_3(%arg0: i32, %arg1: i32) -> (i32, i32) {
    %c0_i32 = arith.constant 0 : i32
    %c0_i32_0 = arith.constant 0 : i32
    return %arg0, %c0_i32 : i32, i32
  }
  func.func @transform_4(%arg0: i32, %arg1: i32) -> (i32, i32) {
    %c0_i32 = arith.constant 0 : i32
    %c0_i32_0 = arith.constant 0 : i32
    return %arg0, %c0_i32 : i32, i32
  }
}

module attributes {stable_mosaic.version = 11 : i64} {
  func.func @_ffn_kernel(%arg0: i32, %arg1: i32, %arg2: memref<16x32xbf16, #tpu.memory_space<vmem>>, %arg3: memref<1x32xbf16, #tpu.memory_space<vmem>>, %arg4: memref<32x64xbf16, #tpu.memory_space<vmem>>, %arg5: memref<32x64xbf16, #tpu.memory_space<vmem>>, %arg6: memref<64x32xbf16, #tpu.memory_space<vmem>>, %arg7: memref<1x32xbf16, #tpu.memory_space<vmem>>, %arg8: memref<16x32xbf16, #tpu.memory_space<vmem>>, %arg9: memref<16x32xbf16, #tpu.memory_space<vmem>>, %arg10: memref<16x32xf32, #tpu.memory_space<vmem>>) attributes {dimension_semantics = [#tpu.dimension_semantics<parallel>, #tpu.dimension_semantics<arbitrary>], iteration_bounds = array<i64: 1, 1>, scalar_prefetch = 0 : i64, scratch_operands = 2 : i64, tpu.core_type = #tpu.core_type<tc>, window_params = [{transform_indices = @transform_0, window_bounds = array<i64: 16, 32>}, {pipeline_mode = #tpu.pipeline_mode<synchronous>, transform_indices = @transform_1, window_bounds = array<i64: 1, 32>}, {transform_indices = @transform_2, window_bounds = array<i64: 32, 64>}, {transform_indices = @transform_3, window_bounds = array<i64: 32, 64>}, {transform_indices = @transform_4, window_bounds = array<i64: 64, 32>}, {pipeline_mode = #tpu.pipeline_mode<synchronous>, transform_indices = @transform_5, window_bounds = array<i64: 1, 32>}, {transform_indices = @transform_6, window_bounds = array<i64: 16, 32>}]} {
    %c0_i32 = arith.constant 0 : i32
    %0 = arith.cmpi eq, %arg1, %c0_i32 : i32
    %1 = arith.extui %0 : i1 to i32
    %c0_i32_0 = arith.constant 0 : i32
    %2 = arith.cmpi ne, %1, %c0_i32_0 : i32
    scf.if %2 {
      %c0_20 = arith.constant 0 : index
      %c0_21 = arith.constant 0 : index
      %31 = vector.load %arg2[%c0_20, %c0_21] : memref<16x32xbf16, #tpu.memory_space<vmem>>, vector<16x32xbf16>
      %32 = arith.extf %31 : vector<16x32xbf16> to vector<16x32xf32>
      %33 = arith.mulf %32, %32 : vector<16x32xf32>
      %cst_22 = arith.constant dense<0.000000e+00> : vector<16xf32>
      %34 = vector.multi_reduction <add>, %33, %cst_22 [1] : vector<16x32xf32> to vector<16xf32>
      %35 = vector.shape_cast %34 : vector<16xf32> to vector<16x1xf32>
      %cst_23 = arith.constant 3.200000e+01 : f32
      %36 = vector.broadcast %cst_23 : f32 to vector<16x1xf32>
      %37 = arith.divf %35, %36 : vector<16x1xf32>
      %cst_24 = arith.constant 9.99999997E-7 : f32
      %38 = vector.broadcast %cst_24 : f32 to vector<16x1xf32>
      %39 = arith.addf %37, %38 : vector<16x1xf32>
      %40 = math.rsqrt %39 : vector<16x1xf32>
      %41 = vector.broadcast %40 : vector<16x1xf32> to vector<16x32xf32>
      %42 = arith.mulf %32, %41 : vector<16x32xf32>
      %c0_25 = arith.constant 0 : index
      %c0_26 = arith.constant 0 : index
      %43 = vector.load %arg3[%c0_25, %c0_26] : memref<1x32xbf16, #tpu.memory_space<vmem>>, vector<1x32xbf16>
      %44 = arith.extf %43 : vector<1x32xbf16> to vector<1x32xf32>
      %cst_27 = arith.constant 1.000000e+00 : f32
      %45 = vector.broadcast %cst_27 : f32 to vector<1x32xf32>
      %46 = arith.addf %45, %44 : vector<1x32xf32>
      %47 = vector.broadcast %46 : vector<1x32xf32> to vector<16x32xf32>
      %48 = arith.mulf %42, %47 : vector<16x32xf32>
      %49 = arith.truncf %48 : vector<16x32xf32> to vector<16x32xbf16>
      %c0_28 = arith.constant 0 : index
      %c0_29 = arith.constant 0 : index
      %50 = vector.load %arg9[%c0_28, %c0_29] : memref<16x32xbf16, #tpu.memory_space<vmem>>, vector<16x32xbf16>
      tpu.vector_store %arg9[%c0_28, %c0_29], %49 {strides = array<i32>} : memref<16x32xbf16, #tpu.memory_space<vmem>>, vector<16x32xbf16>,
      %cst_30 = arith.constant 0.000000e+00 : f32
      %51 = vector.broadcast %cst_30 : f32 to vector<16x32xf32>
      %c0_31 = arith.constant 0 : index
      %c0_32 = arith.constant 0 : index
      %52 = vector.load %arg10[%c0_31, %c0_32] : memref<16x32xf32, #tpu.memory_space<vmem>>, vector<16x32xf32>
      tpu.vector_store %arg10[%c0_31, %c0_32], %51 {strides = array<i32>} : memref<16x32xf32, #tpu.memory_space<vmem>>, vector<16x32xf32>,
    } else {
    }
    %c0 = arith.constant 0 : index
    %c0_1 = arith.constant 0 : index
    %3 = vector.load %arg9[%c0, %c0_1] : memref<16x32xbf16, #tpu.memory_space<vmem>>, vector<16x32xbf16>
    %c0_2 = arith.constant 0 : index
    %c0_3 = arith.constant 0 : index
    %4 = vector.load %arg4[%c0_2, %c0_3] : memref<32x64xbf16, #tpu.memory_space<vmem>>, vector<32x64xbf16>
    %cst = arith.constant dense<0.000000e+00> : vector<16x64xf32>
    %5 = tpu.matmul %3, %4, %cst {dimension_numbers = #tpu.dot_dimension_numbers<[1], [0], [0], [1], [0, 0, 1, 1], [], []>} : vector<16x32xbf16>, vector<32x64xbf16>, vector<16x64xf32> -> vector<16x64xf32>
    %c0_4 = arith.constant 0 : index
    %c0_5 = arith.constant 0 : index
    %6 = vector.load %arg5[%c0_4, %c0_5] : memref<32x64xbf16, #tpu.memory_space<vmem>>, vector<32x64xbf16>
    %cst_6 = arith.constant dense<0.000000e+00> : vector<16x64xf32>
    %7 = tpu.matmul %3, %6, %cst_6 {dimension_numbers = #tpu.dot_dimension_numbers<[1], [0], [0], [1], [0, 0, 1, 1], [], []>} : vector<16x32xbf16>, vector<32x64xbf16>, vector<16x64xf32> -> vector<16x64xf32>
    %8 = arith.mulf %5, %5 : vector<16x64xf32>
    %9 = arith.mulf %5, %8 : vector<16x64xf32>
    %cst_7 = arith.constant 4.471500e-02 : f32
    %10 = vector.broadcast %cst_7 : f32 to vector<16x64xf32>
    %11 = arith.mulf %10, %9 : vector<16x64xf32>
    %12 = arith.addf %5, %11 : vector<16x64xf32>
    %cst_8 = arith.constant 0.797884583 : f32
    %13 = vector.broadcast %cst_8 : f32 to vector<16x64xf32>
    %14 = arith.mulf %13, %12 : vector<16x64xf32>
    %15 = math.tanh %14 : vector<16x64xf32>
    %cst_9 = arith.constant 1.000000e+00 : f32
    %16 = vector.broadcast %cst_9 : f32 to vector<16x64xf32>
    %17 = arith.addf %16, %15 : vector<16x64xf32>
    %cst_10 = arith.constant 5.000000e-01 : f32
    %18 = vector.broadcast %cst_10 : f32 to vector<16x64xf32>
    %19 = arith.mulf %18, %17 : vector<16x64xf32>
    %20 = arith.mulf %5, %19 : vector<16x64xf32>
    %21 = arith.mulf %20, %7 : vector<16x64xf32>
    %c0_11 = arith.constant 0 : index
    %c0_12 = arith.constant 0 : index
    %22 = vector.load %arg10[%c0_11, %c0_12] : memref<16x32xf32, #tpu.memory_space<vmem>>, vector<16x32xf32>
    %23 = arith.truncf %21 : vector<16x64xf32> to vector<16x64xbf16>
    %c0_13 = arith.constant 0 : index
    %c0_14 = arith.constant 0 : index
    %24 = vector.load %arg6[%c0_13, %c0_14] : memref<64x32xbf16, #tpu.memory_space<vmem>>, vector<64x32xbf16>
    %cst_15 = arith.constant dense<0.000000e+00> : vector<16x32xf32>
    %25 = tpu.matmul %23, %24, %cst_15 {dimension_numbers = #tpu.dot_dimension_numbers<[1], [0], [0], [1], [0, 0, 1, 1], [], []>} : vector<16x64xbf16>, vector<64x32xbf16>, vector<16x32xf32> -> vector<16x32xf32>
    %26 = arith.addf %22, %25 : vector<16x32xf32>
    %c0_16 = arith.constant 0 : index
    %c0_17 = arith.constant 0 : index
    %27 = vector.load %arg10[%c0_16, %c0_17] : memref<16x32xf32, #tpu.memory_space<vmem>>, vector<16x32xf32>
    tpu.vector_store %arg10[%c0_16, %c0_17], %26 {strides = array<i32>} : memref<16x32xf32, #tpu.memory_space<vmem>>, vector<16x32xf32>,
    %c0_i32_18 = arith.constant 0 : i32
    %28 = arith.cmpi eq, %arg1, %c0_i32_18 : i32
    %29 = arith.extui %28 : i1 to i32
    %c0_i32_19 = arith.constant 0 : i32
    %30 = arith.cmpi ne, %29, %c0_i32_19 : i32
    scf.if %30 {
      %c0_20 = arith.constant 0 : index
      %c0_21 = arith.constant 0 : index
      %31 = vector.load %arg10[%c0_20, %c0_21] : memref<16x32xf32, #tpu.memory_space<vmem>>, vector<16x32xf32>
      %32 = arith.mulf %31, %31 : vector<16x32xf32>
      %cst_22 = arith.constant dense<0.000000e+00> : vector<16xf32>
      %33 = vector.multi_reduction <add>, %32, %cst_22 [1] : vector<16x32xf32> to vector<16xf32>
      %34 = vector.shape_cast %33 : vector<16xf32> to vector<16x1xf32>
      %cst_23 = arith.constant 3.200000e+01 : f32
      %35 = vector.broadcast %cst_23 : f32 to vector<16x1xf32>
      %36 = arith.divf %34, %35 : vector<16x1xf32>
      %cst_24 = arith.constant 9.99999997E-7 : f32
      %37 = vector.broadcast %cst_24 : f32 to vector<16x1xf32>
      %38 = arith.addf %36, %37 : vector<16x1xf32>
      %39 = math.rsqrt %38 : vector<16x1xf32>
      %40 = vector.broadcast %39 : vector<16x1xf32> to vector<16x32xf32>
      %41 = arith.mulf %31, %40 : vector<16x32xf32>
      %c0_25 = arith.constant 0 : index
      %c0_26 = arith.constant 0 : index
      %42 = vector.load %arg7[%c0_25, %c0_26] : memref<1x32xbf16, #tpu.memory_space<vmem>>, vector<1x32xbf16>
      %43 = arith.extf %42 : vector<1x32xbf16> to vector<1x32xf32>
      %cst_27 = arith.constant 1.000000e+00 : f32
      %44 = vector.broadcast %cst_27 : f32 to vector<1x32xf32>
      %45 = arith.addf %44, %43 : vector<1x32xf32>
      %46 = vector.broadcast %45 : vector<1x32xf32> to vector<16x32xf32>
      %47 = arith.mulf %41, %46 : vector<16x32xf32>
      %c0_28 = arith.constant 0 : index
      %c0_29 = arith.constant 0 : index
      %48 = vector.load %arg2[%c0_28, %c0_29] : memref<16x32xbf16, #tpu.memory_space<vmem>>, vector<16x32xbf16>
      %49 = arith.extf %48 : vector<16x32xbf16> to vector<16x32xf32>
      %50 = arith.addf %49, %47 : vector<16x32xf32>
      %51 = arith.truncf %50 : vector<16x32xf32> to vector<16x32xbf16>
      %c0_30 = arith.constant 0 : index
      %c0_31 = arith.constant 0 : index
      %52 = vector.load %arg8[%c0_30, %c0_31] : memref<16x32xbf16, #tpu.memory_space<vmem>>, vector<16x32xbf16>
      tpu.vector_store %arg8[%c0_30, %c0_31], %51 {strides = array<i32>} : memref<16x32xbf16, #tpu.memory_space<vmem>>, vector<16x32xbf16>,
    } else {
    }
    return
  }
  func.func @transform_0(%arg0: i32, %arg1: i32) -> (i32, i32) {
    %c0_i32 = arith.constant 0 : i32
    %c0_i32_0 = arith.constant 0 : i32
    return %arg0, %c0_i32 : i32, i32
  }
  func.func @transform_1(%arg0: i32, %arg1: i32) -> (i32, i32) {
    %c0_i32 = arith.constant 0 : i32
    %c0_i32_0 = arith.constant 0 : i32
    %c0_i32_1 = arith.constant 0 : i32
    return %c0_i32, %c0_i32_0 : i32, i32
  }
  func.func @transform_2(%arg0: i32, %arg1: i32) -> (i32, i32) {
    %c0_i32 = arith.constant 0 : i32
    %c0_i32_0 = arith.constant 0 : i32
    return %c0_i32, %arg1 : i32, i32
  }
  func.func @transform_3(%arg0: i32, %arg1: i32) -> (i32, i32) {
    %c0_i32 = arith.constant 0 : i32
    %c0_i32_0 = arith.constant 0 : i32
    return %c0_i32, %arg1 : i32, i32
  }
  func.func @transform_4(%arg0: i32, %arg1: i32) -> (i32, i32) {
    %c0_i32 = arith.constant 0 : i32
    %c0_i32_0 = arith.constant 0 : i32
    return %arg1, %c0_i32 : i32, i32
  }
  func.func @transform_5(%arg0: i32, %arg1: i32) -> (i32, i32) {
    %c0_i32 = arith.constant 0 : i32
    %c0_i32_0 = arith.constant 0 : i32
    %c0_i32_1 = arith.constant 0 : i32
    return %c0_i32, %c0_i32_0 : i32, i32
  }
  func.func @transform_6(%arg0: i32, %arg1: i32) -> (i32, i32) {
    %c0_i32 = arith.constant 0 : i32
    %c0_i32_0 = arith.constant 0 : i32
    return %arg0, %c0_i32 : i32, i32
  }
}

module attributes {stable_mosaic.version = 11 : i64} {
  func.func @_norm_matmul_t_kernel(%arg0: i32, %arg1: i32, %arg2: memref<16x32xbf16, #tpu.memory_space<vmem>>, %arg3: memref<1x32xbf16, #tpu.memory_space<vmem>>, %arg4: memref<256x32xbf16, #tpu.memory_space<vmem>>, %arg5: memref<16x256xf32, #tpu.memory_space<vmem>>) attributes {dimension_semantics = [#tpu.dimension_semantics<parallel>, #tpu.dimension_semantics<parallel>], iteration_bounds = array<i64: 1, 1>, scalar_prefetch = 0 : i64, scratch_operands = 0 : i64, tpu.core_type = #tpu.core_type<tc>, window_params = [{transform_indices = @transform_0, window_bounds = array<i64: 16, 32>}, {pipeline_mode = #tpu.pipeline_mode<synchronous>, transform_indices = @transform_1, window_bounds = array<i64: 1, 32>}, {transform_indices = @transform_2, window_bounds = array<i64: 256, 32>}, {transform_indices = @transform_3, window_bounds = array<i64: 16, 256>}]} {
    %c0 = arith.constant 0 : index
    %c0_0 = arith.constant 0 : index
    %0 = vector.load %arg2[%c0, %c0_0] : memref<16x32xbf16, #tpu.memory_space<vmem>>, vector<16x32xbf16>
    %1 = arith.extf %0 : vector<16x32xbf16> to vector<16x32xf32>
    %2 = arith.mulf %1, %1 : vector<16x32xf32>
    %cst = arith.constant dense<0.000000e+00> : vector<16xf32>
    %3 = vector.multi_reduction <add>, %2, %cst [1] : vector<16x32xf32> to vector<16xf32>
    %4 = vector.shape_cast %3 : vector<16xf32> to vector<16x1xf32>
    %cst_1 = arith.constant 3.200000e+01 : f32
    %5 = vector.broadcast %cst_1 : f32 to vector<16x1xf32>
    %6 = arith.divf %4, %5 : vector<16x1xf32>
    %cst_2 = arith.constant 9.99999997E-7 : f32
    %7 = vector.broadcast %cst_2 : f32 to vector<16x1xf32>
    %8 = arith.addf %6, %7 : vector<16x1xf32>
    %9 = math.rsqrt %8 : vector<16x1xf32>
    %10 = vector.broadcast %9 : vector<16x1xf32> to vector<16x32xf32>
    %11 = arith.mulf %1, %10 : vector<16x32xf32>
    %c0_3 = arith.constant 0 : index
    %c0_4 = arith.constant 0 : index
    %12 = vector.load %arg3[%c0_3, %c0_4] : memref<1x32xbf16, #tpu.memory_space<vmem>>, vector<1x32xbf16>
    %13 = arith.extf %12 : vector<1x32xbf16> to vector<1x32xf32>
    %cst_5 = arith.constant 1.000000e+00 : f32
    %14 = vector.broadcast %cst_5 : f32 to vector<1x32xf32>
    %15 = arith.addf %14, %13 : vector<1x32xf32>
    %16 = vector.broadcast %15 : vector<1x32xf32> to vector<16x32xf32>
    %17 = arith.mulf %11, %16 : vector<16x32xf32>
    %18 = arith.truncf %17 : vector<16x32xf32> to vector<16x32xbf16>
    %c0_6 = arith.constant 0 : index
    %c0_7 = arith.constant 0 : index
    %19 = vector.load %arg4[%c0_6, %c0_7] : memref<256x32xbf16, #tpu.memory_space<vmem>>, vector<256x32xbf16>
    %20 = tpu.transpose %19, [1, 0] : vector<256x32xbf16> -> vector<32x256xbf16>
    %cst_8 = arith.constant dense<0.000000e+00> : vector<16x256xf32>
    %21 = tpu.matmul %18, %20, %cst_8 {dimension_numbers = #tpu.dot_dimension_numbers<[1], [0], [0], [1], [0, 0, 1, 1], [], []>} : vector<16x32xbf16>, vector<32x256xbf16>, vector<16x256xf32> -> vector<16x256xf32>
    %c0_9 = arith.constant 0 : index
    %c0_10 = arith.constant 0 : index
    %22 = vector.load %arg5[%c0_9, %c0_10] : memref<16x256xf32, #tpu.memory_space<vmem>>, vector<16x256xf32>
    tpu.vector_store %arg5[%c0_9, %c0_10], %21 {strides = array<i32>} : memref<16x256xf32, #tpu.memory_space<vmem>>, vector<16x256xf32>,
    return
  }
  func.func @transform_0(%arg0: i32, %arg1: i32) -> (i32, i32) {
    %c0_i32 = arith.constant 0 : i32
    %c0_i32_0 = arith.constant 0 : i32
    return %arg0, %c0_i32 : i32, i32
  }
  func.func @transform_1(%arg0: i32, %arg1: i32) -> (i32, i32) {
    %c0_i32 = arith.constant 0 : i32
    %c0_i32_0 = arith.constant 0 : i32
    %c0_i32_1 = arith.constant 0 : i32
    return %c0_i32, %c0_i32_0 : i32, i32
  }
  func.func @transform_2(%arg0: i32, %arg1: i32) -> (i32, i32) {
    %c0_i32 = arith.constant 0 : i32
    %c0_i32_0 = arith.constant 0 : i32
    return %arg1, %c0_i32 : i32, i32
  }
  func.func @transform_3(%arg0: i32, %arg1: i32) -> (i32, i32) {
    %c0_i32 = arith.constant 0 : i32
    return %arg0, %arg1 : i32, i32
  }
}

module attributes {stable_mosaic.version = 11 : i64} {
  func.func @_attn_kernel(%arg0: i32, %arg1: i32, %arg2: i32, %arg3: memref<8x1xi32, #tpu.memory_space<vmem>>, %arg4: memref<1x4x8x8xbf16, #tpu.memory_space<vmem>>, %arg5: memref<1x1x16x8xbf16, #tpu.memory_space<vmem>>, %arg6: memref<1x1x16x8xbf16, #tpu.memory_space<vmem>>, %arg7: memref<1x4x8x8xbf16, #tpu.memory_space<vmem>>, %arg8: memref<32x1xf32, #tpu.memory_space<vmem>>, %arg9: memref<32x1xf32, #tpu.memory_space<vmem>>, %arg10: memref<32x8xf32, #tpu.memory_space<vmem>>) attributes {dimension_semantics = [#tpu.dimension_semantics<parallel>, #tpu.dimension_semantics<parallel>, #tpu.dimension_semantics<arbitrary>], iteration_bounds = array<i64: 2, 1, 1>, scalar_prefetch = 0 : i64, scratch_operands = 3 : i64, tpu.core_type = #tpu.core_type<tc>, window_params = [{pipeline_mode = #tpu.pipeline_mode<synchronous>, transform_indices = @transform_0, window_bounds = array<i64: 8, 1>}, {transform_indices = @transform_1, window_bounds = array<i64: 1, 4, 8, 8>}, {transform_indices = @transform_2, window_bounds = array<i64: 1, 1, 16, 8>}, {transform_indices = @transform_3, window_bounds = array<i64: 1, 1, 16, 8>}, {transform_indices = @transform_4, window_bounds = array<i64: 1, 4, 8, 8>}]} {
    %c0_i32 = arith.constant 0 : i32
    %0 = arith.cmpi eq, %arg2, %c0_i32 : i32
    %1 = arith.extui %0 : i1 to i32
    %c0_i32_0 = arith.constant 0 : i32
    %2 = arith.cmpi ne, %1, %c0_i32_0 : i32
    scf.if %2 {
      %cst_34 = arith.constant -2.38197633E+38 : f32
      %54 = vector.broadcast %cst_34 : f32 to vector<32x1xf32>
      %c0_35 = arith.constant 0 : index
      %c0_36 = arith.constant 0 : index
      %55 = vector.load %arg8[%c0_35, %c0_36] : memref<32x1xf32, #tpu.memory_space<vmem>>, vector<32x1xf32>
      tpu.vector_store %arg8[%c0_35, %c0_36], %54 {strides = array<i32>} : memref<32x1xf32, #tpu.memory_space<vmem>>, vector<32x1xf32>,
      %cst_37 = arith.constant 0.000000e+00 : f32
      %56 = vector.broadcast %cst_37 : f32 to vector<32x1xf32>
      %c0_38 = arith.constant 0 : index
      %c0_39 = arith.constant 0 : index
      %57 = vector.load %arg9[%c0_38, %c0_39] : memref<32x1xf32, #tpu.memory_space<vmem>>, vector<32x1xf32>
      tpu.vector_store %arg9[%c0_38, %c0_39], %56 {strides = array<i32>} : memref<32x1xf32, #tpu.memory_space<vmem>>, vector<32x1xf32>,
      %cst_40 = arith.constant 0.000000e+00 : f32
      %58 = vector.broadcast %cst_40 : f32 to vector<32x8xf32>
      %c0_41 = arith.constant 0 : index
      %c0_42 = arith.constant 0 : index
      %59 = vector.load %arg10[%c0_41, %c0_42] : memref<32x8xf32, #tpu.memory_space<vmem>>, vector<32x8xf32>
      tpu.vector_store %arg10[%c0_41, %c0_42], %58 {strides = array<i32>} : memref<32x8xf32, #tpu.memory_space<vmem>>, vector<32x8xf32>,
    } else {
    }
    %c0 = arith.constant 0 : index
    %c0_1 = arith.constant 0 : index
    %c0_2 = arith.constant 0 : index
    %c0_3 = arith.constant 0 : index
    %3 = vector.load %arg4[%c0, %c0_1, %c0_2, %c0_3] : memref<1x4x8x8xbf16, #tpu.memory_space<vmem>>, vector<1x4x8x8xbf16>
    %4 = vector.shape_cast %3 : vector<1x4x8x8xbf16> to vector<4x8x8xbf16>
    %5 = vector.shape_cast %4 : vector<4x8x8xbf16> to vector<32x8xbf16>
    %6 = arith.extf %5 : vector<32x8xbf16> to vector<32x8xf32>
    %cst = arith.constant 0.353553385 : f32
    %7 = vector.broadcast %cst : f32 to vector<32x8xf32>
    %8 = arith.mulf %6, %7 : vector<32x8xf32>
    %9 = arith.truncf %8 : vector<32x8xf32> to vector<32x8xbf16>
    %c0_4 = arith.constant 0 : index
    %c0_5 = arith.constant 0 : index
    %c0_6 = arith.constant 0 : index
    %c0_7 = arith.constant 0 : index
    %10 = vector.load %arg5[%c0_4, %c0_5, %c0_6, %c0_7] : memref<1x1x16x8xbf16, #tpu.memory_space<vmem>>, vector<1x1x16x8xbf16>
    %11 = vector.shape_cast %10 : vector<1x1x16x8xbf16> to vector<16x8xbf16>
    %12 = tpu.transpose %11, [1, 0] : vector<16x8xbf16> -> vector<8x16xbf16>
    %cst_8 = arith.constant dense<0.000000e+00> : vector<32x16xf32>
    %13 = tpu.matmul %9, %12, %cst_8 {dimension_numbers = #tpu.dot_dimension_numbers<[1], [0], [0], [1], [0, 0, 1, 1], [], []>} : vector<32x8xbf16>, vector<8x16xbf16>, vector<32x16xf32> -> vector<32x16xf32>
    %c0_9 = arith.constant 0 : index
    %c0_10 = arith.constant 0 : index
    %14 = vector.load %arg3[%c0_9, %c0_10] : memref<8x1xi32, #tpu.memory_space<vmem>>, vector<8x1xi32>
    %c16_i32 = arith.constant 16 : i32
    %15 = arith.muli %arg2, %c16_i32 : i32
    %16 = tpu.iota {dimensions = array<i32: 1>} : vector<8x16xi32>
    %17 = vector.broadcast %15 : i32 to vector<8x16xi32>
    %18 = arith.addi %17, %16 : vector<8x16xi32>
    %19 = vector.broadcast %14 : vector<8x1xi32> to vector<8x16xi32>
    %20 = arith.cmpi sle, %18, %19 : vector<8x16xi32>
    %cst_11 = arith.constant 0.000000e+00 : f32
    %cst_12 = arith.constant -2.38197633E+38 : f32
    %21 = vector.broadcast %cst_11 : f32 to vector<8x16xf32>
    %22 = vector.broadcast %cst_12 : f32 to vector<8x16xf32>
    %23 = arith.select %20, %21, %22 : vector<8x16xi1>, vector<8x16xf32>
    %24 = tpu.concatenate %23, %23, %23, %23 in 0 : vector<8x16xf32>, vector<8x16xf32>, vector<8x16xf32>, vector<8x16xf32> -> vector<32x16xf32>
    %25 = arith.addf %13, %24 : vector<32x16xf32>
    %c0_13 = arith.constant 0 : index
    %c0_14 = arith.constant 0 : index
    %26 = vector.load %arg8[%c0_13, %c0_14] : memref<32x1xf32, #tpu.memory_space<vmem>>, vector<32x1xf32>
    %cst_15 = arith.constant dense<0xFF800000> : vector<32xf32>
    %27 = vector.multi_reduction <maximumf>, %25, %cst_15 [1] : vector<32x16xf32> to vector<32xf32>
    %28 = vector.shape_cast %27 : vector<32xf32> to vector<32x1xf32>
    %29 = arith.maximumf %26, %28 : vector<32x1xf32>
    %30 = arith.subf %26, %29 : vector<32x1xf32>
    %31 = math.exp %30 : vector<32x1xf32>
    %32 = vector.broadcast %29 : vector<32x1xf32> to vector<32x16xf32>
    %33 = arith.subf %25, %32 : vector<32x16xf32>
    %34 = math.exp %33 : vector<32x16xf32>
    %c0_16 = arith.constant 0 : index
    %c0_17 = arith.constant 0 : index
    %35 = vector.load %arg9[%c0_16, %c0_17] : memref<32x1xf32, #tpu.memory_space<vmem>>, vector<32x1xf32>
    %36 = arith.mulf %31, %35 : vector<32x1xf32>
    %cst_18 = arith.constant dense<0.000000e+00> : vector<32xf32>
    %37 = vector.multi_reduction <add>, %34, %cst_18 [1] : vector<32x16xf32> to vector<32xf32>
    %38 = vector.shape_cast %37 : vector<32xf32> to vector<32x1xf32>
    %39 = arith.addf %36, %38 : vector<32x1xf32>
    %c0_19 = arith.constant 0 : index
    %c0_20 = arith.constant 0 : index
    %40 = vector.load %arg9[%c0_19, %c0_20] : memref<32x1xf32, #tpu.memory_space<vmem>>, vector<32x1xf32>
    tpu.vector_store %arg9[%c0_19, %c0_20], %39 {strides = array<i32>} : memref<32x1xf32, #tpu.memory_space<vmem>>, vector<32x1xf32>,
    %c0_21 = arith.constant 0 : index
    %c0_22 = arith.constant 0 : index
    %41 = vector.load %arg10[%c0_21, %c0_22] : memref<32x8xf32, #tpu.memory_space<vmem>>, vector<32x8xf32>
    %42 = vector.broadcast %31 : vector<32x1xf32> to vector<32x8xf32>
    %43 = arith.mulf %42, %41 : vector<32x8xf32>
    %44 = arith.truncf %34 : vector<32x16xf32> to vector<32x16xbf16>
    %c0_23 = arith.constant 0 : index
    %c0_24 = arith.constant 0 : index
    %c0_25 = arith.constant 0 : index
    %c0_26 = arith.constant 0 : index
    %45 = vector.load %arg6[%c0_23, %c0_24, %c0_25, %c0_26] : memref<1x1x16x8xbf16, #tpu.memory_space<vmem>>, vector<1x1x16x8xbf16>
    %46 = vector.shape_cast %45 : vector<1x1x16x8xbf16> to vector<16x8xbf16>
    %cst_27 = arith.constant dense<0.000000e+00> : vector<32x8xf32>
    %47 = tpu.matmul %44, %46, %cst_27 {dimension_numbers = #tpu.dot_dimension_numbers<[1], [0], [0], [1], [0, 0, 1, 1], [], []>} : vector<32x16xbf16>, vector<16x8xbf16>, vector<32x8xf32> -> vector<32x8xf32>
    %48 = arith.addf %43, %47 : vector<32x8xf32>
    %c0_28 = arith.constant 0 : index
    %c0_29 = arith.constant 0 : index
    %49 = vector.load %arg10[%c0_28, %c0_29] : memref<32x8xf32, #tpu.memory_space<vmem>>, vector<32x8xf32>
    tpu.vector_store %arg10[%c0_28, %c0_29], %48 {strides = array<i32>} : memref<32x8xf32, #tpu.memory_space<vmem>>, vector<32x8xf32>,
    %c0_30 = arith.constant 0 : index
    %c0_31 = arith.constant 0 : index
    %50 = vector.load %arg8[%c0_30, %c0_31] : memref<32x1xf32, #tpu.memory_space<vmem>>, vector<32x1xf32>
    tpu.vector_store %arg8[%c0_30, %c0_31], %29 {strides = array<i32>} : memref<32x1xf32, #tpu.memory_space<vmem>>, vector<32x1xf32>,
    %c0_i32_32 = arith.constant 0 : i32
    %51 = arith.cmpi eq, %arg2, %c0_i32_32 : i32
    %52 = arith.extui %51 : i1 to i32
    %c0_i32_33 = arith.constant 0 : i32
    %53 = arith.cmpi ne, %52, %c0_i32_33 : i32
    scf.if %53 {
      %c0_34 = arith.constant 0 : index
      %c0_35 = arith.constant 0 : index
      %54 = vector.load %arg10[%c0_34, %c0_35] : memref<32x8xf32, #tpu.memory_space<vmem>>, vector<32x8xf32>
      %c0_36 = arith.constant 0 : index
      %c0_37 = arith.constant 0 : index
      %55 = vector.load %arg9[%c0_36, %c0_37] : memref<32x1xf32, #tpu.memory_space<vmem>>, vector<32x1xf32>
      %56 = tpu.reciprocal %55 {approx = true} : vector<32x1xf32> -> vector<32x1xf32>
      %57 = vector.broadcast %56 : vector<32x1xf32> to vector<32x8xf32>
      %58 = arith.mulf %54, %57 : vector<32x8xf32>
      %59 = vector.shape_cast %58 : vector<32x8xf32> to vector<4x8x8xf32>
      %60 = arith.truncf %59 : vector<4x8x8xf32> to vector<4x8x8xbf16>
      %c0_38 = arith.constant 0 : index
      %c0_39 = arith.constant 0 : index
      %c0_40 = arith.constant 0 : index
      %c0_41 = arith.constant 0 : index
      %61 = vector.load %arg7[%c0_38, %c0_39, %c0_40, %c0_41] : memref<1x4x8x8xbf16, #tpu.memory_space<vmem>>, vector<1x4x8x8xbf16>
      %62 = vector.shape_cast %61 : vector<1x4x8x8xbf16> to vector<4x8x8xbf16>
      %63 = vector.shape_cast %60 : vector<4x8x8xbf16> to vector<1x4x8x8xbf16>
      tpu.vector_store %arg7[%c0_38, %c0_39, %c0_40, %c0_41], %63 {strides = array<i32>} : memref<1x4x8x8xbf16, #tpu.memory_space<vmem>>, vector<1x4x8x8xbf16>,
    } else {
    }
    return
  }
  func.func @transform_0(%arg0: i32, %arg1: i32, %arg2: i32) -> (i32, i32) {
    %c0_i32 = arith.constant 0 : i32
    %c0_i32_0 = arith.constant 0 : i32
    %c0_i32_1 = arith.constant 0 : i32
    return %c0_i32, %c0_i32_0 : i32, i32
  }
  func.func @transform_1(%arg0: i32, %arg1: i32, %arg2: i32) -> (i32, i32, i32, i32) {
    %c0_i32 = arith.constant 0 : i32
    %c0_i32_0 = arith.constant 0 : i32
    %c0_i32_1 = arith.constant 0 : i32
    return %arg0, %arg1, %c0_i32, %c0_i32_0 : i32, i32, i32, i32
  }
  func.func @transform_2(%arg0: i32, %arg1: i32, %arg2: i32) -> (i32, i32, i32, i32) {
    %c0_i32 = arith.constant 0 : i32
    %c0_i32_0 = arith.constant 0 : i32
    return %arg0, %arg1, %arg2, %c0_i32 : i32, i32, i32, i32
  }
  func.func @transform_3(%arg0: i32, %arg1: i32, %arg2: i32) -> (i32, i32, i32, i32) {
    %c0_i32 = arith.constant 0 : i32
    %c0_i32_0 = arith.constant 0 : i32
    return %arg0, %arg1, %arg2, %c0_i32 : i32, i32, i32, i32
  }
  func.func @transform_4(%arg0: i32, %arg1: i32, %arg2: i32) -> (i32, i32, i32, i32) {
    %c0_i32 = arith.constant 0 : i32
    %c0_i32_0 = arith.constant 0 : i32
    %c0_i32_1 = arith.constant 0 : i32
    return %arg0, %arg1, %c0_i32, %c0_i32_0 : i32, i32, i32, i32
  }
}

</mosaic_0001>

<bundles_post_ra>
// kernel: decoder_forward.9
= control target key start
LH: loop header
LB: loop body
LE: loop exit
PB: predicated region body
PF: predicated region fallthrough
CT: control target
= control target key end

     0   :  { %vm21_vm0 = vcmask 261120   ;;  %v152_v7 = vmov 0.0   ;;  %vm153_vm1 = vmmov 0   ;;  %v40_v15 = vlaneseq  ;;  %s195_s0 = inlined_call_operand.vmem [shape: bf16[16,32], index: 0, kind: input, shape index: {}]   ;;  %s196_s2 = inlined_call_operand.vmem [shape: bf16[32,48], index: 2, kind: input, shape index: {}]   ;;  %s197_s1 = inlined_call_operand.vmem [shape: bf16[1,32], index: 1, kind: input, shape index: {}]   ;;  %s198_s3 = inlined_call_operand.vmem [shape: bf16[16,48], index: 3, kind: output, shape index: {}]  }
   0x1   :  { %v130_v0 = vld [vmem:[%s195_s0] sm:$0xff]   ;;  %136 = vmatprep.subr.bf16.mxu0 %v152_v7  ;;  %140 = vmatprep.mubr.msk.bf16.mxu0 %vm153_vm1, %v152_v7  ;;  %v147_v9 = vld [vmem:[%s196_s2 + $0x8] sm:$0xff]   ;;  %vm115_vm2 = vcmask 388096  }
   0x2   :  { %v131_v1 = vunpack.c.l.bf16 %v130_v0  ;;  %v132_v2 = vunpack.c.h.bf16 %v130_v0  ;;  %v146_v8 = vld [vmem:[%s196_s2] sm:$0xff]   ;;  %v41_v19 = vshrl.u32 %v40_v15, 7 }
   0x3   :  { %137 = vmatpush3.bf16.msra.mxu0 %v146_v8  ;;  %v37_v17 = vld [vmem:[%s197_s1] sm:$0x1] }
   0x4   :  { %v19_v3 = vmul.f32 %v131_v1, %v131_v1  ;;  %v20_v4 = vmul.f32 %v132_v2, %v132_v2  ;;  %138 = vmatprep.subr.bf16.mxu0 %v152_v7  ;;  %v38_v18 = vunpack.c.l.bf16 %v37_v17  ;;  %v42_v21 = vsub.s32 0, %v41_v19 }
   0x6   :  { %v22_v5 = vsel %vm21_vm0, %v19_v3, 0.0  ;;  %v25_v6 = vsel %vm21_vm0, %v20_v4, 0.0  ;;  %v39_v20 = vadd.f32 1.0, %v38_v18 }
   0x7   :  { %23 = vadd.xlane.f32.xlu0 %v22_v5  ;;  %139 = vmatpush3.bf16.msra.mxu0 %v147_v9 }
   0x8   :  { %v43_v24 = vrot.slane %v39_v20, %v42_v21 }
   0xb   :  { %26 = vadd.xlane.f32.xlu0 %v25_v6 }
  0x94   :  { %v24_v10 = vpop.xlane.xlu0 %23 }
  0x95   :  { %v29_v11 = vmul.f32 0.03125, %v24_v10 }
  0x97   :  { %v31_v12 = vadd.f32 1e-06, %v29_v11 }
  0x98   :  { %v27_v13 = vpop.xlane.xlu0 %26 }
  0x99   :  { %148 = vrsqrt.f32 %v31_v12  ;;  %v30_v14 = vmul.f32 0.03125, %v27_v13 }
  0x9b   :  { %v32_v16 = vadd.f32 1e-06, %v30_v14 }
  0x9d   :  { %150 = vrsqrt.f32 %v32_v16 }
  0xa3   :  { %v149_v22 = vpop.eup %148 }
  0xa4   :  { %v35_v23 = vmul.f32 %v149_v22, %v131_v1 }
  0xa6   :  { %v44_v27 = vmul.f32 %v43_v24, %v35_v23 }
  0xa7   :  { %v151_v25 = vpop.eup %150 }
  0xa8   :  { %v36_v26 = vmul.f32 %v151_v25, %v132_v2 }
  0xaa   :  { %v45_v28 = vmul.f32 %v43_v24, %v36_v26 }
  0xac   :  { %v46_v29 = vpack.c.bf16 %v45_v28, %v44_v27 }
  0xae   :  { %141 = vmatmul.mubr.msk.bf16.vlgmr.msra.gmra.mrb[0].mxu0 %vm21_vm0, %v46_v29 }
 0x181   :  { %v100_v30 = vpop.f32.mrb[0].mxu0 }
 0x182   :  { %v127_v31 = vpack.c.bf16 %v100_v30, %v100_v30  ;;  %v142_v32 = vpop.f32.mrb[1].mxu0 }
 0x183   :  { %v103_v33 = vpop.f32.mrb[2].mxu0 }
 0x184   :  { %116 = vst.msk [vmem:[%s198_s3] sm:$0xf] %vm115_vm2, %v127_v31  ;;  %v128_v34 = vpack.c.bf16 %v103_v33, %v103_v33  ;;  %v143_v35 = vpop.f32.mrb[3].mxu0 }
 0x186   :  { %117 = vst.msk [vmem:[%s198_s3 + $0x4] sm:$0xf] %vm115_vm2, %v128_v34 }

// kernel: decoder_forward.11
= control target key start
LH: loop header
LB: loop body
LE: loop exit
PB: predicated region body
PF: predicated region fallthrough
CT: control target
= control target key end

     0   :  { %vm22_vm0 = vcmask 261120   ;;  %v183_v0 = vmov 0.0   ;;  %vm184_vm1 = vmmov 0   ;;  %v124_v20 = vlaneseq  ;;  %s238_s1 = inlined_call_operand.vmem [shape: bf16[32,32], index: 1, kind: input, shape index: {}]   ;;  %s239_s0 = inlined_call_operand.vmem [shape: bf16[16,32], index: 0, kind: input, shape index: {}]   ;;  %s240_s2 = inlined_call_operand.vmem [shape: bf16[1,32], index: 2, kind: input, shape index: {}]   ;;  %s241_s3 = inlined_call_operand.vmem [shape: bf16[16,32], index: 3, kind: input, shape index: {}]   ;;  %s242_s4 = inlined_call_operand.vmem [shape: bf16[16,32], index: 4, kind: output, shape index: {}]  }
   0x1   :  { %166 = vmatprep.subr.bf16.mxu0 %v183_v0  ;;  %v176_v1 = vld [vmem:[%s238_s1] sm:$0xff]   ;;  %170 = vmatprep.mubr.msk.bf16.mxu0 %vm184_vm1, %v183_v0  ;;  %23 = vst.msk [vmem:[#allocation2] sm:$0xff] %vm22_vm0, %v183_v0  ;;  %24 = vst.msk [vmem:[#allocation2 + $0x8] sm:$0xff] %vm22_vm0, %v183_v0  ;;  %v177_v2 = vld [vmem:[%s238_s1 + $0x8] sm:$0xff]   ;;  %vm144_vm2 = vcmask 257024  }
   0x2   :  { %167 = vmatpush3.bf16.msra.mxu0 %v176_v1  ;;  %v178_v3 = vld [vmem:[%s239_s0] sm:$0xff]   ;;  %v125_v26 = vshrl.u32 %v124_v20, 7 }
   0x3   :  { %168 = vmatprep.subr.bf16.mxu0 %v183_v0  ;;  %v121_v21 = vld [vmem:[%s240_s2] sm:$0x1] }
   0x4   :  { %v122_v25 = vunpack.c.l.bf16 %v121_v21  ;;  %v126_v29 = vsub.s32 0, %v125_v26  ;;  %v160_v30 = vld [vmem:[%s241_s3] sm:$0xff]  }
   0x5   :  { %v161_v33 = vunpack.c.l.bf16 %v160_v30  ;;  %v162_v38 = vunpack.c.h.bf16 %v160_v30 }
   0x6   :  { %169 = vmatpush3.bf16.msra.mxu0 %v177_v2  ;;  %v123_v28 = vadd.f32 1.0, %v122_v25 }
   0x8   :  { %v25_v4 = vld [vmem:[#allocation2] sm:$0xff]  ;;  %v26_v6 = vld [vmem:[#allocation2 + $0x8] sm:$0xff]  ;;  %v127_v31 = vrot.slane %v123_v28, %v126_v29 }
   0x9   :  { %171 = vmatmul.mubr.msk.bf16.vlgmr.msra.gmra.mrb[0].mxu0 %vm22_vm0, %v178_v3 }
  0xdc   :  { %v88_v5 = vpop.f32.mrb[0].mxu0 }
  0xdd   :  { %v95_v7 = vadd.f32 %v88_v5, %v25_v4  ;;  %v172_v8 = vpop.f32.mrb[1].mxu0 }
  0xde   :  { %v91_v9 = vpop.f32.mrb[2].mxu0 }
  0xdf   :  { %97 = vst.msk [vmem:[#allocation2] sm:$0xff] %vm22_vm0, %v95_v7  ;;  %v96_v10 = vadd.f32 %v91_v9, %v26_v6  ;;  %v173_v11 = vpop.f32.mrb[3].mxu0 }
  0xe1   :  { %98 = vst.msk [vmem:[#allocation2 + $0x8] sm:$0xff] %vm22_vm0, %v96_v10 }
  0xe6   :  { %v102_v12 = vld [vmem:[#allocation2] sm:$0xff] }
  0xe7   :  { %v104_v13 = vmul.f32 %v102_v12, %v102_v12 }
  0xe8   :  { %v103_v14 = vld [vmem:[#allocation2 + $0x8] sm:$0xff] }
  0xe9   :  { %v106_v15 = vsel %vm22_vm0, %v104_v13, 0.0  ;;  %v105_v16 = vmul.f32 %v103_v14, %v103_v14 }
  0xea   :  { %107 = vadd.xlane.f32.xlu0 %v106_v15 }
  0xeb   :  { %v109_v17 = vsel %vm22_vm0, %v105_v16, 0.0 }
  0xee   :  { %110 = vadd.xlane.f32.xlu0 %v109_v17 }
 0x177   :  { %v108_v18 = vpop.xlane.xlu0 %107 }
 0x178   :  { %v113_v19 = vmul.f32 0.03125, %v108_v18 }
 0x17a   :  { %v115_v22 = vadd.f32 1e-06, %v113_v19 }
 0x17b   :  { %v111_v23 = vpop.xlane.xlu0 %110 }
 0x17c   :  { %179 = vrsqrt.f32 %v115_v22  ;;  %v114_v24 = vmul.f32 0.03125, %v111_v23 }
 0x17e   :  { %v116_v27 = vadd.f32 1e-06, %v114_v24 }
 0x180   :  { %181 = vrsqrt.f32 %v116_v27 }
 0x186   :  { %v180_v32 = vpop.eup %179 }
 0x187   :  { %v119_v34 = vmul.f32 %v180_v32, %v102_v12 }
 0x189   :  { %v128_v35 = vmul.f32 %v127_v31, %v119_v34 }
 0x18a   :  { %v182_v36 = vpop.eup %181 }
 0x18b   :  { %v134_v37 = vadd.f32 %v161_v33, %v128_v35  ;;  %v120_v39 = vmul.f32 %v182_v36, %v103_v14 }
 0x18d   :  { %v157_v40 = vpack.c.bf16 %v134_v37, %v134_v37  ;;  %v129_v41 = vmul.f32 %v127_v31, %v120_v39 }
 0x18f   :  { %145 = vst.msk [vmem:[%s242_s4] sm:$0xf] %vm144_vm2, %v157_v40  ;;  %v135_v42 = vadd.f32 %v162_v38, %v129_v41 }
 0x191   :  { %v158_v43 = vpack.c.bf16 %v135_v42, %v135_v42 }
 0x193   :  { %146 = vst.msk [vmem:[%s242_s4 + $0x4] sm:$0xf] %vm144_vm2, %v158_v43 }

// kernel: decoder_forward.10
= control target key start
LH: loop header
LB: loop body
LE: loop exit
PB: predicated region body
PF: predicated region fallthrough
CT: control target
= control target key end

     0   :  { %s1012_s15 = smov 0   ;;  %s1014_s16 = smov 0   ;;  %s1116_s0 = inlined_call_operand.vmem [shape: s32[8,1], index: 0, kind: input, shape index: {}]   ;;  %s1117_s1 = inlined_call_operand.vmem [shape: bf16[2,4,8,8], index: 1, kind: input, shape index: {}]   ;;  %s1118_s2 = inlined_call_operand.vmem [shape: bf16[2,1,16,8], index: 2, kind: input, shape index: {}]   ;;  %s1119_s3 = inlined_call_operand.vmem [shape: bf16[2,1,16,8], index: 3, kind: input, shape index: {}]   ;;  %s1120_s4 = inlined_call_operand.vmem [shape: bf16[2,4,8,8], index: 4, kind: output, shape index: {}]  }
   0x1   :  { %s1016_s17 = smov 0  }
   0x2 LB: > { %s33_s18 = sadd.s32 1, %s978_s16  ;;  %p855_p0 = scmp.ge.s32.totalorder %s982_s17, 1  ;;  %s982_s17 = sphi %s1016_s17, %s14_s17   ;;  %s978_s16 = sphi %s1014_s16, %s1122_s16   ;;  %s974_s15 = sphi %s1012_s15, %s1121_s15  }
   0x3   : > { %p35_p1 = scmp.ge.s32.totalorder %s33_s18, 2  ;;  %p236_p2 = scmp.lt.s32.totalorder %s982_s17, 3 }
   0x5   : > { %s1124_s18 = smov (%p35_p1, %s33_s18), 0  ;;  %p237_p3 = pnand %p855_p0, %p236_p2 }
   0x6   : > { %p297_p4 = scmp.lt.s32.totalorder (!%p237_p3), %s974_s15, 1  ;;  %v379_v0 = vld [vmem:[%s1116_s0] sm:$0xff] (!%p237_p3)  ;;  %v984_v1 = vmov (!%p237_p3), 0   ;;  %vm358_vm0 = vcmask (!%p237_p3), 64512   ;;  %vm349_vm1 = vcmask (!%p237_p3), 7168   ;;  %v381_v20 = vlaneseq (!%p237_p3) }
   0x7   : > { %240 = sbr.rel (%p237_p3) target bundleno = 832 (0x340), region = 36  ;;  %932 = vset.pattern.permute.xlu0 (!%p237_p3), %v984_v1  ;;  %933 = vset.pattern.permute.xlu1 (!%p237_p3), %v984_v1  ;;  %v395_v2 = vadd.s32 (!%p237_p3), 4, %v379_v0  ;;  %v864_v3 = vadd.s32 (!%p237_p3), 4294967292, %v379_v0  ;;  %v985_v18 = vmov (!%p237_p3), -2.3819763e+38   ;;  %vm470_vm7 = vcmask (!%p237_p3), 130048  }
   0x8   : > { %386 = vperm.xlu0 (!%p237_p3), %932, %v379_v0   ;;  %350 = vst.msk [vmem:[#allocation2] sm:$0xff] (!%p237_p3), %vm349_vm1, %v985_v18  ;;  %351 = vst.msk [vmem:[#allocation2 + $0x8] sm:$0xff] (!%p237_p3), %vm349_vm1, %v985_v18  ;;  %v382_v21 = vand.u32 (!%p237_p3), 127, %v381_v20  ;;  %v986_v37 = vmov (!%p237_p3), 0.0   ;;  %vm708_vm8 = vcmask (!%p237_p3), 60416  }
   0x9   : > { %397 = vperm.xlu1 (!%p237_p3), %933, %v395_v2   ;;  %352 = vst.msk [vmem:[#allocation2 + $0x10] sm:$0xff] (!%p237_p3), %vm349_vm1, %v985_v18  ;;  %353 = vst.msk [vmem:[#allocation2 + $0x18] sm:$0xff] (!%p237_p3), %vm349_vm1, %v985_v18 }
   0xa   : > { %354 = vst.msk [vmem:[#allocation3] sm:$0xff] (!%p237_p3), %vm349_vm1, %v986_v37  ;;  %355 = vst.msk [vmem:[#allocation3 + $0x8] sm:$0xff] (!%p237_p3), %vm349_vm1, %v986_v37 }
   0xb   : > { %356 = vst.msk [vmem:[#allocation3 + $0x10] sm:$0xff] (!%p237_p3), %vm349_vm1, %v986_v37  ;;  %357 = vst.msk [vmem:[#allocation3 + $0x18] sm:$0xff] (!%p237_p3), %vm349_vm1, %v986_v37 }
   0xc   : > { %391 = vperm.xlu0 (!%p237_p3), %932, %v864_v3   ;;  %359 = vst.msk [vmem:[#allocation4] sm:$0xff] (!%p237_p3), %vm358_vm0, %v986_v37  ;;  %360 = vst.msk [vmem:[#allocation4 + $0x8] sm:$0xff] (!%p237_p3), %vm358_vm0, %v986_v37 }
   0xd   : > { %361 = vst.msk [vmem:[#allocation4 + $0x10] sm:$0xff] (!%p237_p3), %vm358_vm0, %v986_v37  ;;  %362 = vst.msk [vmem:[#allocation4 + $0x18] sm:$0xff] (!%p237_p3), %vm358_vm0, %v986_v37 }
   0xe   : > { %s1126_s15 = smov (!%p297_p4, %s974_s15), 1 }
   0xf   : > { %s874_s21 = sshll.u32 %s1126_s15, 3  ;;  %s873_s22 = sshll.u32 %s1126_s15, 4  ;;  %v1070_v38 = vld [vmem:[#allocation2] sm:$0xff]  ;;  %v467_v40 = vld [vmem:[#allocation2 + $0x8] sm:$0xff] }
  0x10   : > { %s318_s25 = scalar_lea.vmem %s1118_s2, %s874_s21  ;;  %s304_s28 = scalar_lea.vmem %s1117_s1, %s873_s22  ;;  %v469_v43 = vld [vmem:[#allocation2 + $0x18] sm:$0xff]  ;;  %v468_v47 = vld [vmem:[#allocation2 + $0x10] sm:$0xff] }
  0x11   : > { %v934_v4 = vld [vmem:[%s318_s25] sm:$0xff]   ;;  %v885_v6 = vld [vmem:[%s304_s28 + $0x8] sm:$0xff]   ;;  %s332_s5 = scalar_lea.vmem %s1119_s3, %s874_s21  ;;  %s342_s8 = scalar_lea.vmem %s1120_s4, %s873_s22 }
  0x12   : > { %v878_v5 = vld [vmem:[%s304_s28] sm:$0xff]   ;;  %904 = vmatprep.subr.msk.bf16.mxu0 %vm358_vm0, %v934_v4  ;;  %v415_v7 = vsel %vm358_vm0, %v934_v4, 0  ;;  %v883_v10 = vunpack.c.l.bf16 %v885_v6  ;;  %v884_v11 = vunpack.c.h.bf16 %v885_v6 }
  0x13   : > { %v879_v8 = vunpack.c.l.bf16 %v878_v5  ;;  %v880_v9 = vunpack.c.h.bf16 %v878_v5  ;;  %893 = vmatpush3.bf16.xpose.msra.mxu0 %v415_v7  ;;  %v935_v54 = vld [vmem:[%s332_s5] sm:$0xff]  }
  0x14   : > { %v373_v14 = vmul.f32 0.35355338, %v883_v10  ;;  %v374_v15 = vmul.f32 0.35355338, %v884_v11  ;;  %898 = vmatprep.subr.bf16.mxu1 %v935_v54 }
  0x15   : > { %v371_v12 = vmul.f32 0.35355338, %v879_v8  ;;  %v372_v13 = vmul.f32 0.35355338, %v880_v9  ;;  %899 = vmatpush3.bf16.msra.mxu1 %v935_v54 }
  0x16   : > { %v376_v17 = vpack.c.bf16 %v374_v15, %v373_v14 }
  0x17   : > { %v375_v16 = vpack.c.bf16 %v372_v13, %v371_v12 }
  0x19   : > { %894 = vmatprep.mubr.msk.bf16.mxu0 %vm358_vm0, %v375_v16 }
  0x1a   : > { %895 = vmatmul.mubr.msk.bf16.vlgmr.msra.gmra.mrb[0].mxu0 %vm358_vm0, %v376_v17 }
  0x87   : > { %v387_v19 = vpop.permute.xlu0 %386 }
  0x88   : > { %vm388_vm2 = vcmp.le.s32.totalorder %v382_v21, %v387_v19  ;;  %v398_v23 = vpop.permute.xlu1 %397 }
  0x89   : > { %vm399_vm5 = vcmp.lt.s32.totalorder %v382_v21, %v398_v23 }
  0x8b   : > { %v392_v22 = vpop.permute.xlu0 %391 }
  0x8c   : > { %vm393_vm3 = vcmp.gt.s32.totalorder %v382_v21, %v392_v22  ;;  %v531_v21 = vld [vmem:[#allocation3] sm:$0xff]  ;;  %v532_v22 = vld [vmem:[#allocation3 + $0x8] sm:$0xff] }
  0x8d   : > { %vm394_vm4 = vmand %vm388_vm2, %vm393_vm3 }
  0x8e   : > { %vm400_vm6 = vmand %vm394_vm4, %vm399_vm5 }
  0x8f   : > { %v401_v24 = vsel %vm400_vm6, 0.0, %v985_v18 }
  0xed   : > { %v896_v25 = vpop.f32.mrb[0].mxu0 }
  0xee   : > { %v1055_v26 = vadd.f32 %v896_v25, %v401_v24  ;;  %v451_v27 = vpop.f32.mrb[1].mxu0  ;;  %v534_v25 = vld [vmem:[#allocation3 + $0x18] sm:$0xff] }
  0xef   : > { %v452_v28 = vadd.f32 %v451_v27, %v401_v24  ;;  %v897_v29 = vpop.f32.mrb[2].mxu0 }
  0xf0   : > { %v463_v30 = vadd.f32 %v897_v29, %v401_v24  ;;  %v454_v31 = vpop.f32.mrb[3].mxu0  ;;  %v477_v36 = vsel %vm470_vm7, %v1055_v26, -inf  ;;  %v533_v29 = vld [vmem:[#allocation3 + $0x10] sm:$0xff] }
  0xf1   : > { %v455_v32 = vadd.f32 %v454_v31, %v401_v24  ;;  %v471_v33 = vsel %vm470_vm7, %v452_v28, -inf }
  0xf2   : > { %472 = vmax.xlane.f32.xlu1 %v471_v33  ;;  %v480_v35 = vsel %vm470_vm7, %v463_v30, -inf }
  0xf3   : > { %v474_v34 = vsel %vm470_vm7, %v455_v32, -inf }
  0xf4   : > { %475 = vmax.xlane.f32.xlu0 %v474_v34 }
  0xf6   : > { %481 = vmax.xlane.f32.xlu1 %v480_v35 }
  0xf8   : > { %478 = vmax.xlane.f32.xlu0 %v477_v36 }
 0x17f   : > { %v473_v39 = vpop.xlane.xlu1 %472 }
 0x180   : > { %v483_v41 = vmax.f32 %v1070_v38, %v473_v39 }
 0x181   : > { %v476_v42 = vpop.xlane.xlu0 %475 }
 0x182   : > { %v487_v44 = vsub.f32 %v1070_v38, %v483_v41  ;;  %661 = vst.msk [vmem:[#allocation2] sm:$0xff] %vm349_vm1, %v483_v41  ;;  %v484_v45 = vmax.f32 %v467_v40, %v476_v42  ;;  %501 = vperm.xlu0 %932, %v483_v41  }
 0x183   : > { %v482_v46 = vpop.xlane.xlu1 %481 }
 0x184   : > { %v488_v48 = vsub.f32 %v467_v40, %v484_v45  ;;  %662 = vst.msk [vmem:[#allocation2 + $0x8] sm:$0xff] %vm349_vm1, %v484_v45  ;;  %v486_v49 = vmax.f32 %v469_v43, %v482_v46  ;;  %506 = vperm.xlu1 %933, %v484_v45   ;;  %v491_v15 = vmul.f32 1.442695, %v487_v44 }
 0x185   : > { %v479_v50 = vpop.xlane.xlu0 %478 }
 0x186   : > { %v490_v51 = vsub.f32 %v469_v43, %v486_v49  ;;  %664 = vst.msk [vmem:[#allocation2 + $0x18] sm:$0xff] %vm349_vm1, %v486_v49  ;;  %v485_v52 = vmax.f32 %v468_v47, %v479_v50  ;;  %516 = vperm.xlu0 %932, %v486_v49   ;;  %v493_v13 = vmul.f32 1.442695, %v488_v48  ;;  %v560_v49 = vld [vmem:[#allocation4] sm:$0xff]  ;;  %v563_v50 = vld [vmem:[#allocation4 + $0x18] sm:$0xff] }
 0x188   : > { %v489_v53 = vsub.f32 %v468_v47, %v485_v52  ;;  %663 = vst.msk [vmem:[#allocation2 + $0x10] sm:$0xff] %vm349_vm1, %v485_v52  ;;  %511 = vperm.xlu1 %933, %v485_v52   ;;  %v497_v16 = vmul.f32 1.442695, %v490_v51  ;;  %v562_v47 = vld [vmem:[#allocation4 + $0x10] sm:$0xff]  ;;  %v561_v52 = vld [vmem:[#allocation4 + $0x8] sm:$0xff] }
 0x18a   : > { %v495_v14 = vmul.f32 1.442695, %v489_v53 }
 0x201   : > { %v502_v55 = vpop.permute.xlu0 %501 }
 0x202   : > { %v519_v56 = vsub.f32 %v452_v28, %v502_v55 }
 0x203   : > { %v507_v57 = vpop.permute.xlu1 %506 }
 0x204   : > { %v523_v58 = vmul.f32 1.442695, %v519_v56  ;;  %v520_v59 = vsub.f32 %v455_v32, %v507_v57 }
 0x205   : > { %v517_v60 = vpop.permute.xlu0 %516 }
 0x206   : > { %936 = vpow2.f32 %v523_v58  ;;  %v525_v61 = vmul.f32 1.442695, %v520_v59  ;;  %v522_v62 = vsub.f32 %v463_v30, %v517_v60 }
 0x207   : > { %v512_v63 = vpop.permute.xlu1 %511 }
 0x208   : > { %938 = vpow2.f32 %v525_v61  ;;  %v529_v0 = vmul.f32 1.442695, %v522_v62  ;;  %v521_v1 = vsub.f32 %v1055_v26, %v512_v63 }
 0x20a   : > { %940 = vpow2.f32 %v529_v0  ;;  %v527_v2 = vmul.f32 1.442695, %v521_v1 }
 0x20c   : > { %942 = vpow2.f32 %v527_v2 }
 0x20d   : > { %944 = vpow2.f32 %v493_v13 }
 0x20e   : > { %946 = vpow2.f32 %v495_v14 }
 0x20f   : > { %948 = vpow2.f32 %v491_v15 }
 0x210   : > { %v937_v3 = vpop.eup %936  ;;  %950 = vpow2.f32 %v497_v16 }
 0x211   : > { %v539_v4 = vsel %vm470_vm7, %v937_v3, 0.0 }
 0x212   : > { %v939_v5 = vpop.eup %938  ;;  %540 = vadd.xlane.f32.xlu1 %v539_v4 }
 0x213   : > { %v542_v6 = vsel %vm470_vm7, %v939_v5, 0.0  ;;  %v588_v7 = vpack.c.bf16 %v939_v5, %v937_v3 }
 0x214   : > { %v941_v8 = vpop.eup %940  ;;  %543 = vadd.xlane.f32.xlu0 %v542_v6 }
 0x215   : > { %900 = vmatprep.mubr.msk.bf16.mxu1 %vm470_vm7, %v588_v7  ;;  %v548_v9 = vsel %vm470_vm7, %v941_v8, 0.0 }
 0x216   : > { %v943_v10 = vpop.eup %942  ;;  %549 = vadd.xlane.f32.xlu1 %v548_v9 }
 0x217   : > { %v545_v11 = vsel %vm470_vm7, %v943_v10, 0.0  ;;  %v589_v12 = vpack.c.bf16 %v941_v8, %v943_v10  ;;  %v945_v17 = vpop.eup %944 }
 0x218   : > { %546 = vadd.xlane.f32.xlu0 %v545_v11  ;;  %v947_v18 = vpop.eup %946  ;;  %v536_v27 = vmul.f32 %v945_v17, %v532_v22 }
 0x219   : > { %901 = vmatmul.mubr.msk.bf16.vlgmr.msra.gmra.mrb[0].mxu1 %vm470_vm7, %v589_v12  ;;  %v949_v19 = vpop.eup %948  ;;  %v537_v34 = vmul.f32 %v947_v18, %v533_v29 }
 0x21a   : > { %v951_v20 = vpop.eup %950  ;;  %v535_v23 = vmul.f32 %v949_v19, %v531_v21 }
 0x21b   : > { %v538_v31 = vmul.f32 %v951_v20, %v534_v25 }
 0x227   : > { %571 = vperm.xlu1 %933, %v945_v17  }
 0x22b   : > { %576 = vperm.xlu1 %933, %v947_v18  }
 0x22e   : > { %566 = vperm.xlu0 %932, %v949_v19  }
 0x232   : > { %581 = vperm.xlu0 %932, %v951_v20  }
 0x29f   : > { %v541_v24 = vpop.xlane.xlu1 %540 }
 0x2a0   : > { %v551_v26 = vadd.f32 %v541_v24, %v535_v23 }
 0x2a1   : > { %v544_v28 = vpop.xlane.xlu0 %543 }
 0x2a2   : > { %556 = vst.msk [vmem:[#allocation3] sm:$0xff] %vm349_vm1, %v551_v26  ;;  %v552_v30 = vadd.f32 %v544_v28, %v536_v27 }
 0x2a3   : > { %v550_v32 = vpop.xlane.xlu1 %549 }
 0x2a4   : > { %557 = vst.msk [vmem:[#allocation3 + $0x8] sm:$0xff] %vm349_vm1, %v552_v30  ;;  %v554_v33 = vadd.f32 %v550_v32, %v538_v31 }
 0x2a5   : > { %v547_v35 = vpop.xlane.xlu0 %546 }
 0x2a6   : > { %559 = vst.msk [vmem:[#allocation3 + $0x18] sm:$0xff] %vm349_vm1, %v554_v33  ;;  %v553_v36 = vadd.f32 %v547_v35, %v537_v34 }
 0x2a7   : > { %v572_v45 = vpop.permute.xlu1 %571 }
 0x2a8   : > { %558 = vst.msk [vmem:[#allocation3 + $0x10] sm:$0xff] %vm349_vm1, %v553_v36  ;;  %v585_v59 = vmul.f32 %v572_v45, %v561_v52 }
 0x2a9   : > { %v672_v37 = vld [vmem:[#allocation3] sm:$0xff] }
 0x2aa   : > { %952 = vrcp.f32 %v672_v37 }
 0x2ab   : > { %v673_v38 = vld [vmem:[#allocation3 + $0x8] sm:$0xff]  ;;  %v577_v48 = vpop.permute.xlu1 %576 }
 0x2ac   : > { %954 = vrcp.f32 %v673_v38  ;;  %v586_v53 = vmul.f32 %v577_v48, %v562_v47 }
 0x2ad   : > { %v675_v39 = vld [vmem:[#allocation3 + $0x18] sm:$0xff]  ;;  %v567_v46 = vpop.permute.xlu0 %566 }
 0x2ae   : > { %956 = vrcp.f32 %v675_v39  ;;  %v584_v54 = vmul.f32 %v567_v46, %v560_v49 }
 0x2af   : > { %v674_v40 = vld [vmem:[#allocation3 + $0x10] sm:$0xff] }
 0x2b0   : > { %958 = vrcp.f32 %v674_v40 }
 0x2b1   : > { %v582_v51 = vpop.permute.xlu0 %581 }
 0x2b2   : > { %v587_v56 = vmul.f32 %v582_v51, %v563_v50 }
 0x2b4   : > { %v953_v41 = vpop.eup %952 }
 0x2b5   : > { %682 = vperm.xlu1 %933, %v953_v41  }
 0x2b6   : > { %v955_v42 = vpop.eup %954 }
 0x2b7   : > { %687 = vperm.xlu0 %932, %v955_v42  }
 0x2b8   : > { %v957_v43 = vpop.eup %956 }
 0x2ba   : > { %v959_v44 = vpop.eup %958 }
 0x2bb   : > { %692 = vperm.xlu1 %933, %v959_v44   ;;  %697 = vperm.xlu0 %932, %v957_v43  }
 0x2ec   : > { %v902_v55 = vpop.f32.mrb[0].mxu1 }
 0x2ed   : > { %v655_v57 = vadd.f32 %v902_v55, %v586_v53  ;;  %v638_v58 = vpop.f32.mrb[1].mxu1 }
 0x2ee   : > { %v653_v60 = vadd.f32 %v638_v58, %v584_v54  ;;  %v903_v61 = vpop.f32.mrb[2].mxu1 }
 0x2ef   : > { %659 = vst.msk [vmem:[#allocation4 + $0x10] sm:$0xff] %vm358_vm0, %v655_v57  ;;  %v656_v62 = vadd.f32 %v903_v61, %v587_v56  ;;  %v641_v63 = vpop.f32.mrb[3].mxu1 }
 0x2f0   : > { %657 = vst.msk [vmem:[#allocation4] sm:$0xff] %vm358_vm0, %v653_v60  ;;  %v654_v0 = vadd.f32 %v641_v63, %v585_v59 }
 0x2f1   : > { %660 = vst.msk [vmem:[#allocation4 + $0x18] sm:$0xff] %vm358_vm0, %v656_v62 }
 0x2f2   : > { %658 = vst.msk [vmem:[#allocation4 + $0x8] sm:$0xff] %vm358_vm0, %v654_v0 }
 0x2f6   : > { %v670_v11 = vld [vmem:[#allocation4 + $0x10] sm:$0xff] }
 0x2f7   : > { %v668_v1 = vld [vmem:[#allocation4] sm:$0xff] }
 0x2f8   : > { %v671_v9 = vld [vmem:[#allocation4 + $0x18] sm:$0xff] }
 0x2f9   : > { %v669_v5 = vld [vmem:[#allocation4 + $0x8] sm:$0xff] }
 0x334   : > { %v683_v2 = vpop.permute.xlu1 %682 }
 0x335   : > { %v700_v3 = vmul.f32 %v683_v2, %v668_v1 }
 0x336   : > { %v688_v4 = vpop.permute.xlu0 %687 }
 0x337   : > { %v704_v6 = vpack.c.bf16 %v700_v3, %v700_v3  ;;  %v701_v7 = vmul.f32 %v688_v4, %v669_v5 }
 0x339   : > { %709 = vst.msk [vmem:[%s342_s8] sm:$0xf] %vm708_vm8, %v704_v6  ;;  %v705_v8 = vpack.c.bf16 %v701_v7, %v701_v7 }
 0x33a   : > { %v698_v10 = vpop.permute.xlu0 %697  ;;  %v693_v12 = vpop.permute.xlu1 %692 }
 0x33b   : > { %710 = vst.msk [vmem:[%s342_s8 + $0x4] sm:$0xf] %vm708_vm8, %v705_v8  ;;  %v703_v13 = vmul.f32 %v698_v10, %v671_v9  ;;  %v702_v14 = vmul.f32 %v693_v12, %v670_v11 }
 0x33d   : > { %v707_v15 = vpack.c.bf16 %v703_v13, %v703_v13  ;;  %v706_v16 = vpack.c.bf16 %v702_v14, %v702_v14 }
 0x33f   : > { %712 = vst.msk [vmem:[%s342_s8 + $0xc] sm:$0xf] %vm708_vm8, %v707_v15  ;;  %711 = vst.msk [vmem:[%s342_s8 + $0x8] sm:$0xf] %vm708_vm8, %v706_v16 }
 0x340 PF: > { %s14_s17 = sadd.s32 1, %s982_s17   ;;  %s1121_s15 = smov %s978_s16 }
 0x341   : > { %p11_p5 = scmp.ge.s32.totalorder %s14_s17, 4   ;;  %s1122_s16 = smov %s1124_s18 }
 0x343   :  { %13 = sbr.rel (!%p11_p5) target bundleno = 2 (0x2), region = 80 }

// kernel: decoder_forward.12
= control target key start
LH: loop header
LB: loop body
LE: loop exit
PB: predicated region body
PF: predicated region fallthrough
CT: control target
= control target key end

     0   :  { %vm34_vm0 = vcmask 261120   ;;  %v422_v8 = vmov 0.0   ;;  %vm423_vm1 = vmmov 0   ;;  %v53_v15 = vlaneseq  ;;  %s531_s0 = inlined_call_operand.vmem [shape: bf16[16,32], index: 0, kind: input, shape index: {}]   ;;  %s532_s2 = inlined_call_operand.vmem [shape: bf16[32,64], index: 2, kind: input, shape index: {}]   ;;  %s533_s3 = inlined_call_operand.vmem [shape: bf16[32,64], index: 3, kind: input, shape index: {}]   ;;  %s534_s1 = inlined_call_operand.vmem [shape: bf16[1,32], index: 1, kind: input, shape index: {}]   ;;  %s535_s4 = inlined_call_operand.vmem [shape: bf16[64,32], index: 4, kind: input, shape index: {}]   ;;  %s536_s5 = inlined_call_operand.vmem [shape: bf16[1,32], index: 5, kind: input, shape index: {}]   ;;  %s537_s6 = inlined_call_operand.vmem [shape: bf16[16,32], index: 6, kind: output, shape index: {}]  }
   0x1   :  { %v354_v0 = vld [vmem:[%s531_s0] sm:$0xff]   ;;  %372 = vmatprep.subr.bf16.mxu1 %v422_v8  ;;  %61 = vst.msk [vmem:[#allocation3] sm:$0xff] %vm34_vm0, %v422_v8  ;;  %62 = vst.msk [vmem:[#allocation3 + $0x8] sm:$0xff] %vm34_vm0, %v422_v8  ;;  %388 = vmatprep.subr.bf16.mxu0 %v422_v8  ;;  %v403_v9 = vld [vmem:[%s532_s2 + $0x8] sm:$0xff]   ;;  %vm237_vm2 = vcmask 523264   ;;  %vm331_vm3 = vcmask 257024  }
   0x2   :  { %v462_v1 = vunpack.c.l.bf16 %v354_v0  ;;  %v464_v2 = vunpack.c.h.bf16 %v354_v0  ;;  %v402_v7 = vld [vmem:[%s532_s2] sm:$0xff]   ;;  %376 = vmatprep.mubr.msk.bf16.mxu1 %vm423_vm1, %v422_v8  ;;  %396 = vmatprep.mubr.msk.bf16.mxu0 %vm423_vm1, %v422_v8  ;;  %v485_v19 = vshrl.u32 %v53_v15, 7  ;;  %v405_v32 = vld [vmem:[%s533_s3 + $0x8] sm:$0xff]   ;;  %v408_v35 = vld [vmem:[%s535_s4 + $0x10] sm:$0xff]  }
   0x3   :  { %373 = vmatpush3.bf16.msra.mxu1 %v402_v7  ;;  %v50_v16 = vld [vmem:[%s534_s1] sm:$0x1]  ;;  %v407_v34 = vld [vmem:[%s535_s4 + $0x8] sm:$0xff]   ;;  %v409_v36 = vld [vmem:[%s535_s4 + $0x18] sm:$0xff]  }
   0x4   :  { %v32_v3 = vmul.f32 %v462_v1, %v462_v1  ;;  %v33_v4 = vmul.f32 %v464_v2, %v464_v2  ;;  %374 = vmatprep.subr.bf16.mxu1 %v422_v8  ;;  %v51_v18 = vunpack.c.l.bf16 %v50_v16  ;;  %v55_v21 = vsub.s32 0, %v485_v19  ;;  %v404_v30 = vld [vmem:[%s533_s3] sm:$0xff]  }
   0x5   :  { %v406_v33 = vld [vmem:[%s535_s4] sm:$0xff]  }
   0x6   :  { %v35_v5 = vsel %vm34_vm0, %v32_v3, 0.0  ;;  %v38_v6 = vsel %vm34_vm0, %v33_v4, 0.0  ;;  %v52_v20 = vadd.f32 1.0, %v51_v18  ;;  %389 = vmatpush3.bf16.msra.mxu0 %v406_v33 }
   0x7   :  { %36 = vadd.xlane.f32.xlu0 %v35_v5  ;;  %375 = vmatpush3.bf16.msra.mxu1 %v403_v9 }
   0x8   :  { %380 = vmatprep.subr.bf16.mxu1 %v422_v8  ;;  %v56_v23 = vrot.slane %v52_v20, %v55_v21  ;;  %390 = vmatprep.subr.bf16.mxu0 %v422_v8  ;;  %v202_v4 = vld [vmem:[#allocation3] sm:$0xff] }
   0xa   :  { %391 = vmatpush3.bf16.msra.mxu0 %v407_v34 }
   0xb   :  { %39 = vadd.xlane.f32.xlu0 %v38_v6  ;;  %392 = vmatprep.subr.bf16.mxu0 %v422_v8  ;;  %v203_v6 = vld [vmem:[#allocation3 + $0x8] sm:$0xff] }
   0xe   :  { %393 = vmatpush3.bf16.msra.mxu0 %v408_v35 }
   0xf   :  { %394 = vmatprep.subr.bf16.mxu0 %v422_v8 }
  0x12   :  { %395 = vmatpush3.bf16.msra.mxu0 %v409_v36 }
  0x94   :  { %v37_v10 = vpop.xlane.xlu0 %36 }
  0x95   :  { %v42_v11 = vmul.f32 0.03125, %v37_v10 }
  0x97   :  { %v44_v12 = vadd.f32 1e-06, %v42_v11 }
  0x98   :  { %v40_v13 = vpop.xlane.xlu0 %39 }
  0x99   :  { %410 = vrsqrt.f32 %v44_v12  ;;  %v43_v14 = vmul.f32 0.03125, %v40_v13 }
  0x9b   :  { %v45_v17 = vadd.f32 1e-06, %v43_v14 }
  0x9d   :  { %412 = vrsqrt.f32 %v45_v17 }
  0xa3   :  { %v411_v22 = vpop.eup %410 }
  0xa4   :  { %v48_v24 = vmul.f32 %v411_v22, %v462_v1  ;;  %v308_v22 = vld [vmem:[%s536_s5] sm:$0x1] }
  0xa6   :  { %v57_v27 = vmul.f32 %v56_v23, %v48_v24 }
  0xa7   :  { %v413_v25 = vpop.eup %412 }
  0xa8   :  { %v49_v26 = vmul.f32 %v413_v25, %v464_v2 }
  0xaa   :  { %v58_v28 = vmul.f32 %v56_v23, %v49_v26  ;;  %v309_v26 = vunpack.c.l.bf16 %v308_v22 }
  0xac   :  { %v59_v29 = vpack.c.bf16 %v58_v28, %v57_v27  ;;  %v310_v28 = vadd.f32 1.0, %v309_v26 }
  0xae   :  { %60 = vst.msk [vmem:[#allocation2] sm:$0xff] %vm34_vm0, %v59_v29  ;;  %v314_v29 = vrot.slane %v310_v28, %v55_v21 }
  0xb5   :  { %v63_v31 = vld [vmem:[#allocation2] sm:$0xff] }
  0xb6   :  { %377 = vmatmul.mubr.msk.bf16.vlgmr.msra.gmra.mrb[0].mxu1 %vm34_vm0, %v63_v31 }
  0xb7   :  { %381 = vmatpush3.bf16.msra.mxu1 %v404_v30  ;;  %384 = vmatprep.mubr.msk.bf16.mxu1 %vm423_vm1, %v422_v8 }
  0xb8   :  { %382 = vmatprep.subr.bf16.mxu1 %v422_v8 }
  0xbb   :  { %383 = vmatpush3.bf16.msra.mxu1 %v405_v32 }
  0xbe   :  { %385 = vmatmul.mubr.msk.bf16.vlgmr.msra.gmra.mrb[4].mxu1 %vm34_vm0, %v63_v31 }
 0x189   :  { %v118_v37 = vpop.f32.mrb[0].mxu1 }
 0x18a   :  { %v182_v38 = vmul.f32 %v118_v37, %v118_v37  ;;  %v378_v39 = vpop.f32.mrb[1].mxu1 }
 0x18b   :  { %v121_v40 = vpop.f32.mrb[2].mxu1 }
 0x18c   :  { %v184_v41 = vmul.f32 %v182_v38, %v118_v37  ;;  %v183_v42 = vmul.f32 %v121_v40, %v121_v40  ;;  %v379_v43 = vpop.f32.mrb[3].mxu1 }
 0x18e   :  { %v186_v44 = vmul.f32 0.044715, %v184_v41  ;;  %v185_v45 = vmul.f32 %v183_v42, %v121_v40 }
 0x190   :  { %v188_v46 = vadd.f32 %v186_v44, %v118_v37  ;;  %v187_v47 = vmul.f32 0.044715, %v185_v45 }
 0x191   :  { %v175_v48 = vpop.f32.mrb[4].mxu1 }
 0x192   :  { %v190_v49 = vmul.f32 0.7978846, %v188_v46  ;;  %v189_v50 = vadd.f32 %v187_v47, %v121_v40  ;;  %v386_v51 = vpop.f32.mrb[5].mxu1 }
 0x193   :  { %v178_v52 = vpop.f32.mrb[6].mxu1 }
 0x194   :  { %414 = vtanh.f32 %v190_v49  ;;  %v191_v53 = vmul.f32 0.7978846, %v189_v50  ;;  %v387_v54 = vpop.f32.mrb[7].mxu1 }
 0x196   :  { %416 = vtanh.f32 %v191_v53 }
 0x19e   :  { %v415_v55 = vpop.eup %414 }
 0x19f   :  { %v194_v56 = vadd.f32 1.0, %v415_v55 }
 0x1a0   :  { %v417_v57 = vpop.eup %416 }
 0x1a1   :  { %v196_v58 = vmul.f32 0.5, %v194_v56  ;;  %v195_v59 = vadd.f32 1.0, %v417_v57 }
 0x1a3   :  { %v198_v60 = vmul.f32 %v196_v58, %v118_v37  ;;  %v197_v61 = vmul.f32 0.5, %v195_v59 }
 0x1a5   :  { %v200_v62 = vmul.f32 %v198_v60, %v175_v48  ;;  %v199_v63 = vmul.f32 %v197_v61, %v121_v40 }
 0x1a7   :  { %v201_v0 = vmul.f32 %v199_v63, %v178_v52 }
 0x1a9   :  { %v204_v3 = vpack.c.bf16 %v201_v0, %v200_v62 }
 0x1ab   :  { %397 = vmatmul.mubr.msk.bf16.vlgmr.msra.gmra.mrb[0].mxu0 %vm237_vm2, %v204_v3 }
 0x27e   :  { %v275_v5 = vpop.f32.mrb[0].mxu0 }
 0x27f   :  { %v282_v7 = vadd.f32 %v275_v5, %v202_v4  ;;  %v398_v8 = vpop.f32.mrb[1].mxu0 }
 0x280   :  { %v278_v9 = vpop.f32.mrb[2].mxu0 }
 0x281   :  { %284 = vst.msk [vmem:[#allocation3] sm:$0xff] %vm34_vm0, %v282_v7  ;;  %v283_v10 = vadd.f32 %v278_v9, %v203_v6  ;;  %v399_v11 = vpop.f32.mrb[3].mxu0 }
 0x283   :  { %285 = vst.msk [vmem:[#allocation3 + $0x8] sm:$0xff] %vm34_vm0, %v283_v10 }
 0x288   :  { %v289_v12 = vld [vmem:[#allocation3] sm:$0xff] }
 0x289   :  { %v291_v13 = vmul.f32 %v289_v12, %v289_v12 }
 0x28a   :  { %v290_v14 = vld [vmem:[#allocation3 + $0x8] sm:$0xff] }
 0x28b   :  { %v293_v15 = vsel %vm34_vm0, %v291_v13, 0.0  ;;  %v292_v16 = vmul.f32 %v290_v14, %v290_v14 }
 0x28c   :  { %294 = vadd.xlane.f32.xlu1 %v293_v15 }
 0x28d   :  { %v296_v17 = vsel %vm34_vm0, %v292_v16, 0.0 }
 0x290   :  { %297 = vadd.xlane.f32.xlu1 %v296_v17 }
 0x319   :  { %v295_v18 = vpop.xlane.xlu1 %294 }
 0x31a   :  { %v300_v20 = vmul.f32 0.03125, %v295_v18 }
 0x31c   :  { %v302_v23 = vadd.f32 1e-06, %v300_v20 }
 0x31d   :  { %v298_v24 = vpop.xlane.xlu1 %297 }
 0x31e   :  { %418 = vrsqrt.f32 %v302_v23  ;;  %v301_v25 = vmul.f32 0.03125, %v298_v24 }
 0x320   :  { %v303_v27 = vadd.f32 1e-06, %v301_v25 }
 0x322   :  { %420 = vrsqrt.f32 %v303_v27 }
 0x328   :  { %v419_v30 = vpop.eup %418 }
 0x329   :  { %v306_v31 = vmul.f32 %v419_v30, %v289_v12 }
 0x32b   :  { %v315_v32 = vmul.f32 %v314_v29, %v306_v31 }
 0x32c   :  { %v421_v33 = vpop.eup %420 }
 0x32d   :  { %v321_v34 = vadd.f32 %v462_v1, %v315_v32  ;;  %v307_v35 = vmul.f32 %v421_v33, %v290_v14 }
 0x32f   :  { %v351_v36 = vpack.c.bf16 %v321_v34, %v321_v34  ;;  %v316_v37 = vmul.f32 %v314_v29, %v307_v35 }
 0x331   :  { %332 = vst.msk [vmem:[%s537_s6] sm:$0xf] %vm331_vm3, %v351_v36  ;;  %v322_v38 = vadd.f32 %v464_v2, %v316_v37 }
 0x333   :  { %v352_v39 = vpack.c.bf16 %v322_v38, %v322_v38 }
 0x335   :  { %333 = vst.msk [vmem:[%s537_s6 + $0x4] sm:$0xf] %vm331_vm3, %v352_v39 }

// kernel: decoder_forward.17
= control target key start
LH: loop header
LB: loop body
LE: loop exit
PB: predicated region body
PF: predicated region fallthrough
CT: control target
= control target key end

     0   :  { %vm22_vm0 = vcmask 261120   ;;  %s487_s0 = inlined_call_operand.vmem [shape: bf16[16,32], index: 0, kind: input, shape index: {}]   ;;  %s488_s1 = inlined_call_operand.vmem [shape: bf16[1,32], index: 1, kind: input, shape index: {}]   ;;  %s489_s2 = inlined_call_operand.vmem [shape: bf16[256,32], index: 2, kind: input, shape index: {}]   ;;  %s490_s3 = inlined_call_operand.hbm [shape: f32[16,256], index: 3, kind: output, shape index: {}]  }
   0x1   :  { %v292_v0 = vld [vmem:[%s487_s0] sm:$0xff]   ;;  %v326_v7 = vld [vmem:[%s489_s2 + $0x48] sm:$0xff]   ;;  %v328_v13 = vld [vmem:[%s489_s2 + $0x50] sm:$0xff]  }
   0x2   :  { %v394_v1 = vunpack.c.l.bf16 %v292_v0  ;;  %v396_v2 = vunpack.c.h.bf16 %v292_v0  ;;  %v324_v3 = vld [vmem:[%s489_s2 + $0x40] sm:$0xff]   ;;  %v327_v10 = vld [vmem:[%s489_s2 + $0x8] sm:$0xff]   ;;  %v329_v14 = vld [vmem:[%s489_s2 + $0x10] sm:$0xff]  }
   0x3   :  { %v325_v4 = vld [vmem:[%s489_s2] sm:$0xff]   ;;  %313 = vmatprep.subr.msk.bf16.mxu0 %vm22_vm0, %v324_v3  ;;  %v167_v12 = vsel %vm22_vm0, %v327_v10, 0 }
   0x4   :  { %v20_v5 = vmul.f32 %v394_v1, %v394_v1  ;;  %v21_v6 = vmul.f32 %v396_v2, %v396_v2  ;;  %v164_v8 = vsel %vm22_vm0, %v325_v4, 0 }
   0x5   :  { %296 = vmatpush3.bf16.xpose.msra.mxu0 %v164_v8 }
   0x6   :  { %v23_v9 = vsel %vm22_vm0, %v20_v5, 0.0  ;;  %314 = vmatprep.subr.msk.bf16.mxu0 %vm22_vm0, %v326_v7  ;;  %v26_v11 = vsel %vm22_vm0, %v21_v6, 0.0 }
   0x7   :  { %24 = vadd.xlane.f32.xlu0 %v23_v9 }
   0xb   :  { %27 = vadd.xlane.f32.xlu0 %v26_v11 }
   0xd   :  { %298 = vmatpush3.bf16.xpose.msra.mxu0 %v167_v12 }
   0xe   :  { %315 = vmatprep.subr.msk.bf16.mxu0 %vm22_vm0, %v328_v13 }
   0xf   :  { %8 = vsyncpa [#allocation3], 0  ;;  %v170_v15 = vsel %vm22_vm0, %v329_v14, 0  ;;  %v330_v16 = vld [vmem:[%s489_s2 + $0x58] sm:$0xff]   ;;  %v332_v19 = vld [vmem:[%s489_s2 + $0x60] sm:$0xff]   ;;  %v41_v36 = vlaneseq }
  0x10   :  { %v331_v17 = vld [vmem:[%s489_s2 + $0x18] sm:$0xff]   ;;  %v333_v20 = vld [vmem:[%s489_s2 + $0x20] sm:$0xff]   ;;  %v334_v22 = vld [vmem:[%s489_s2 + $0x68] sm:$0xff]  }
  0x11   :  { %v173_v18 = vsel %vm22_vm0, %v331_v17, 0  ;;  %v176_v21 = vsel %vm22_vm0, %v333_v20, 0  ;;  %v335_v23 = vld [vmem:[%s489_s2 + $0x28] sm:$0xff]   ;;  %v336_v25 = vld [vmem:[%s489_s2 + $0x70] sm:$0xff]   ;;  %v338_v28 = vld [vmem:[%s489_s2 + $0x78] sm:$0xff]   ;;  %v42_v40 = vshrl.u32 %v41_v36, 7 }
  0x12   :  { %v179_v24 = vsel %vm22_vm0, %v335_v23, 0  ;;  %v337_v26 = vld [vmem:[%s489_s2 + $0x30] sm:$0xff]   ;;  %v339_v29 = vld [vmem:[%s489_s2 + $0x38] sm:$0xff]   ;;  %v38_v38 = vld [vmem:[%s488_s1] sm:$0x1]  ;;  %s368_s1 = smov [#allocation2]  }
  0x13   :  { %v182_v27 = vsel %vm22_vm0, %v337_v26, 0  ;;  %v185_v30 = vsel %vm22_vm0, %v339_v29, 0  ;;  %v39_v39 = vunpack.c.l.bf16 %v38_v38  ;;  %v43_v42 = vsub.s32 0, %v42_v40  ;;  %s263_s2 = sshll.u32 %s368_s1, 4  ;;  %s264_s2 = int_to_ptr.vmem [resolvable:$true] %s263_s2 }
  0x14   :  { %s344_s19 = scalar_lea.vmem %s264_s2, 512  ;;  %p349_p1 = scmp.lt.s32.totalorder %s264_s2, %s264_s2 }
  0x15   :  { %300 = vmatpush3.bf16.xpose.msra.mxu0 %v170_v15  ;;  %v40_v41 = vadd.f32 1.0, %v39_v39  ;;  %p345_p0 = scmp.ne.s32.totalorder %s264_s2, %s344_s19  ;;  %p350_p2 = scmp.lt.s32.totalorder %s344_s19, %s344_s19 }
  0x16   :  { %316 = vmatprep.subr.msk.bf16.mxu0 %vm22_vm0, %v330_v16 }
  0x17   :  { %v44_v45 = vrot.slane %v40_v41, %v43_v42  ;;  %p351_p3 = por %p350_p2, %p349_p1 }
  0x19   :  { %p352_p4 = pnand %p351_p3, %p345_p0 }
  0x1d   :  { %302 = vmatpush3.bf16.xpose.msra.mxu0 %v173_v18 }
  0x1e   :  { %317 = vmatprep.subr.msk.bf16.mxu0 %vm22_vm0, %v332_v19 }
  0x25   :  { %304 = vmatpush3.bf16.xpose.msra.mxu0 %v176_v21 }
  0x26   :  { %318 = vmatprep.subr.msk.bf16.mxu0 %vm22_vm0, %v334_v22 }
  0x2d   :  { %306 = vmatpush3.bf16.xpose.msra.mxu0 %v179_v24 }
  0x2e   :  { %319 = vmatprep.subr.msk.bf16.mxu0 %vm22_vm0, %v336_v25 }
  0x35   :  { %308 = vmatpush3.bf16.xpose.msra.mxu0 %v182_v27 }
  0x36   :  { %320 = vmatprep.subr.msk.bf16.mxu0 %vm22_vm0, %v338_v28 }
  0x3d   :  { %310 = vmatpush3.bf16.xpose.msra.mxu0 %v185_v30 }
  0x94   :  { %v25_v31 = vpop.xlane.xlu0 %24 }
  0x95   :  { %v30_v32 = vmul.f32 0.03125, %v25_v31 }
  0x97   :  { %v32_v33 = vadd.f32 1e-06, %v30_v32 }
  0x98   :  { %v28_v34 = vpop.xlane.xlu0 %27 }
  0x99   :  { %340 = vrsqrt.f32 %v32_v33  ;;  %v31_v35 = vmul.f32 0.03125, %v28_v34 }
  0x9b   :  { %v33_v37 = vadd.f32 1e-06, %v31_v35 }
  0x9d   :  { %342 = vrsqrt.f32 %v33_v37 }
  0xa3   :  { %v341_v43 = vpop.eup %340 }
  0xa4   :  { %v36_v44 = vmul.f32 %v341_v43, %v394_v1 }
  0xa6   :  { %v45_v48 = vmul.f32 %v44_v45, %v36_v44 }
  0xa7   :  { %v343_v46 = vpop.eup %342 }
  0xa8   :  { %v37_v47 = vmul.f32 %v343_v46, %v396_v2 }
  0xaa   :  { %v46_v49 = vmul.f32 %v44_v45, %v37_v47 }
  0xac   :  { %v47_v50 = vpack.c.bf16 %v46_v49, %v45_v48 }
  0xae   :  { %311 = vmatprep.mubr.msk.bf16.mxu0 %vm22_vm0, %v47_v50 }
  0xaf   :  { %312 = vmatmul.mubr.msk.bf16.vlgmr.msra.gmra.mrb[0].mxu0 %vm22_vm0, %v47_v50 }
 0x182   :  { %v245_v51 = vpop.f32.mrb[0].mxu0 }
 0x183   :  { %254 = vst [vmem:[#allocation2] sm:$0xff] %v245_v51  ;;  %v247_v52 = vpop.f32.mrb[1].mxu0 }
 0x184   :  { %255 = vst [vmem:[#allocation2 + $0x8] sm:$0xff] %v247_v52  ;;  %v249_v53 = vpop.f32.mrb[2].mxu0 }
 0x185   :  { %256 = vst [vmem:[#allocation2 + $0x10] sm:$0xff] %v249_v53  ;;  %v251_v54 = vpop.f32.mrb[3].mxu0 }
 0x186   :  { %257 = vst [vmem:[#allocation2 + $0x18] sm:$0xff] %v251_v54 }
 0x187   :  { %355 = shalt.err (!%p352_p4)
}
 0x188   :  { %s356_s22 = scalar_lea.hbm %s490_s3, 512 }
 0x189   :  { %p357_p5 = scmp.ne.s32.totalorder %s490_s3, %s356_s22  ;;  %p360_p6 = scmp.lt.u32.totalorder %s356_s22, %s490_s3 }
 0x18b   :  { %p362_p7 = pnand %p360_p6, %p357_p5 }
 0x18d   :  { %365 = shalt.err (!%p362_p7)
}
 0x18e   :  { %s369_s27 = smov 256   ;;  %s370_s28 = smov 16  }
 0x18f   :  { %269 = dma.vmem_to_hbm [thread:$0]  %s264_s2, 512, %s490_s3, [#allocation3], %s369_s27, %s369_s27, %s370_s28  }
 0x190   :  { %366 = dma.done.wait [#allocation3], 512  }
 0x191   :  { %367 = vsyncadd [#allocation3], 4294966784 }
 0x192   :  { %273 = vsyncpa [#allocation3], 1 }

// kernel: decoder_forward.14
= control target key start
LH: loop header
LB: loop body
LE: loop exit
PB: predicated region body
PF: predicated region fallthrough
CT: control target
= control target key end

     0   :  { %s999_s15 = smov 0   ;;  %s1001_s16 = smov 0   ;;  %s1103_s0 = inlined_call_operand.vmem [shape: s32[8,1], index: 0, kind: input, shape index: {}]   ;;  %s1104_s1 = inlined_call_operand.vmem [shape: bf16[2,4,8,8], index: 1, kind: input, shape index: {}]   ;;  %s1105_s2 = inlined_call_operand.vmem [shape: bf16[2,1,16,8], index: 2, kind: input, shape index: {}]   ;;  %s1106_s3 = inlined_call_operand.vmem [shape: bf16[2,1,16,8], index: 3, kind: input, shape index: {}]   ;;  %s1107_s4 = inlined_call_operand.vmem [shape: bf16[2,4,8,8], index: 4, kind: output, shape index: {}]  }
   0x1   :  { %s1003_s17 = smov 0  }
   0x2 LB: > { %s33_s18 = sadd.s32 1, %s965_s16  ;;  %p843_p0 = scmp.ge.s32.totalorder %s969_s17, 1  ;;  %s969_s17 = sphi %s1003_s17, %s14_s17   ;;  %s965_s16 = sphi %s1001_s16, %s1109_s16   ;;  %s961_s15 = sphi %s999_s15, %s1108_s15  }
   0x3   : > { %p35_p1 = scmp.ge.s32.totalorder %s33_s18, 2  ;;  %p236_p2 = scmp.lt.s32.totalorder %s969_s17, 3 }
   0x5   : > { %s1111_s18 = smov (%p35_p1, %s33_s18), 0  ;;  %p237_p3 = pnand %p843_p0, %p236_p2 }
   0x6   : > { %p297_p4 = scmp.lt.s32.totalorder (!%p237_p3), %s961_s15, 1  ;;  %v379_v0 = vld [vmem:[%s1103_s0] sm:$0xff] (!%p237_p3)  ;;  %v971_v1 = vmov (!%p237_p3), 0   ;;  %vm358_vm0 = vcmask (!%p237_p3), 64512   ;;  %vm349_vm1 = vcmask (!%p237_p3), 7168   ;;  %v381_v17 = vlaneseq (!%p237_p3) }
   0x7   : > { %240 = sbr.rel (%p237_p3) target bundleno = 838 (0x346), region = 36  ;;  %919 = vset.pattern.permute.xlu0 (!%p237_p3), %v971_v1  ;;  %920 = vset.pattern.permute.xlu1 (!%p237_p3), %v971_v1  ;;  %v972_v16 = vmov (!%p237_p3), -2.3819763e+38   ;;  %vm458_vm3 = vcmask (!%p237_p3), 130048   ;;  %v973_v33 = vmov (!%p237_p3), 0.0   ;;  %vm696_vm4 = vcmask (!%p237_p3), 60416  }
   0x8   : > { %386 = vperm.xlu0 (!%p237_p3), %919, %v379_v0   ;;  %352 = vst.msk [vmem:[#allocation2 + $0x10] sm:$0xff] (!%p237_p3), %vm349_vm1, %v972_v16  ;;  %350 = vst.msk [vmem:[#allocation2] sm:$0xff] (!%p237_p3), %vm349_vm1, %v972_v16  ;;  %v382_v18 = vand.u32 (!%p237_p3), 127, %v381_v17 }
   0x9   : > { %351 = vst.msk [vmem:[#allocation2 + $0x8] sm:$0xff] (!%p237_p3), %vm349_vm1, %v972_v16  ;;  %353 = vst.msk [vmem:[#allocation2 + $0x18] sm:$0xff] (!%p237_p3), %vm349_vm1, %v972_v16 }
   0xa   : > { %354 = vst.msk [vmem:[#allocation3] sm:$0xff] (!%p237_p3), %vm349_vm1, %v973_v33  ;;  %355 = vst.msk [vmem:[#allocation3 + $0x8] sm:$0xff] (!%p237_p3), %vm349_vm1, %v973_v33 }
   0xb   : > { %356 = vst.msk [vmem:[#allocation3 + $0x10] sm:$0xff] (!%p237_p3), %vm349_vm1, %v973_v33  ;;  %357 = vst.msk [vmem:[#allocation3 + $0x18] sm:$0xff] (!%p237_p3), %vm349_vm1, %v973_v33 }
   0xc   : > { %359 = vst.msk [vmem:[#allocation4] sm:$0xff] (!%p237_p3), %vm358_vm0, %v973_v33  ;;  %360 = vst.msk [vmem:[#allocation4 + $0x8] sm:$0xff] (!%p237_p3), %vm358_vm0, %v973_v33 }
   0xd   : > { %361 = vst.msk [vmem:[#allocation4 + $0x10] sm:$0xff] (!%p237_p3), %vm358_vm0, %v973_v33  ;;  %362 = vst.msk [vmem:[#allocation4 + $0x18] sm:$0xff] (!%p237_p3), %vm358_vm0, %v973_v33 }
   0xe   : > { %s1113_s15 = smov (!%p297_p4, %s961_s15), 1 }
   0xf   : > { %s861_s21 = sshll.u32 %s1113_s15, 3  ;;  %s860_s22 = sshll.u32 %s1113_s15, 4  ;;  %v1057_v34 = vld [vmem:[#allocation2 + $0x10] sm:$0xff]  ;;  %v454_v35 = vld [vmem:[#allocation2] sm:$0xff] }
  0x10   : > { %s318_s25 = scalar_lea.vmem %s1105_s2, %s861_s21  ;;  %s304_s28 = scalar_lea.vmem %s1104_s1, %s860_s22  ;;  %v455_v40 = vld [vmem:[#allocation2 + $0x8] sm:$0xff]  ;;  %v457_v45 = vld [vmem:[#allocation2 + $0x18] sm:$0xff] }
  0x11   : > { %v921_v2 = vld [vmem:[%s318_s25] sm:$0xff]   ;;  %v872_v4 = vld [vmem:[%s304_s28 + $0x8] sm:$0xff]   ;;  %s332_s5 = scalar_lea.vmem %s1106_s3, %s861_s21  ;;  %s342_s8 = scalar_lea.vmem %s1107_s4, %s860_s22 }
  0x12   : > { %v865_v3 = vld [vmem:[%s304_s28] sm:$0xff]   ;;  %891 = vmatprep.subr.msk.bf16.mxu0 %vm358_vm0, %v921_v2  ;;  %v403_v5 = vsel %vm358_vm0, %v921_v2, 0  ;;  %v870_v8 = vunpack.c.l.bf16 %v872_v4  ;;  %v871_v9 = vunpack.c.h.bf16 %v872_v4 }
  0x13   : > { %v866_v6 = vunpack.c.l.bf16 %v865_v3  ;;  %v867_v7 = vunpack.c.h.bf16 %v865_v3  ;;  %880 = vmatpush3.bf16.xpose.msra.mxu0 %v403_v5  ;;  %v922_v50 = vld [vmem:[%s332_s5] sm:$0xff]  }
  0x14   : > { %v373_v12 = vmul.f32 0.35355338, %v870_v8  ;;  %v374_v13 = vmul.f32 0.35355338, %v871_v9  ;;  %885 = vmatprep.subr.bf16.mxu1 %v922_v50  ;;  %v519_v17 = vld [vmem:[#allocation3] sm:$0xff] }
  0x15   : > { %v371_v10 = vmul.f32 0.35355338, %v866_v6  ;;  %v372_v11 = vmul.f32 0.35355338, %v867_v7  ;;  %886 = vmatpush3.bf16.msra.mxu1 %v922_v50 }
  0x16   : > { %v376_v15 = vpack.c.bf16 %v374_v13, %v373_v12 }
  0x17   : > { %v375_v14 = vpack.c.bf16 %v372_v11, %v371_v10 }
  0x19   : > { %881 = vmatprep.mubr.msk.bf16.mxu0 %vm358_vm0, %v375_v14 }
  0x1a   : > { %882 = vmatmul.mubr.msk.bf16.vlgmr.msra.gmra.mrb[0].mxu0 %vm358_vm0, %v376_v15 }
  0x87   : > { %v387_v19 = vpop.permute.xlu0 %386 }
  0x88   : > { %vm388_vm2 = vcmp.le.s32.totalorder %v382_v18, %v387_v19 }
  0x89   : > { %v389_v20 = vsel %vm388_vm2, 0.0, %v972_v16 }
  0xed   : > { %v883_v21 = vpop.f32.mrb[0].mxu0 }
  0xee   : > { %v1042_v22 = vadd.f32 %v883_v21, %v389_v20  ;;  %v439_v23 = vpop.f32.mrb[1].mxu0 }
  0xef   : > { %v440_v24 = vadd.f32 %v439_v23, %v389_v20  ;;  %v884_v25 = vpop.f32.mrb[2].mxu0 }
  0xf0   : > { %v451_v26 = vadd.f32 %v884_v25, %v389_v20  ;;  %v442_v27 = vpop.f32.mrb[3].mxu0  ;;  %v465_v28 = vsel %vm458_vm3, %v1042_v22, -inf }
  0xf1   : > { %v443_v29 = vadd.f32 %v442_v27, %v389_v20  ;;  %466 = vmax.xlane.f32.xlu1 %v465_v28  ;;  %v459_v30 = vsel %vm458_vm3, %v440_v24, -inf  ;;  %v520_v20 = vld [vmem:[#allocation3 + $0x8] sm:$0xff]  ;;  %v522_v28 = vld [vmem:[#allocation3 + $0x18] sm:$0xff] }
  0xf2   : > { %460 = vmax.xlane.f32.xlu0 %v459_v30  ;;  %v468_v32 = vsel %vm458_vm3, %v451_v26, -inf }
  0xf3   : > { %v462_v31 = vsel %vm458_vm3, %v443_v29, -inf }
  0xf5   : > { %463 = vmax.xlane.f32.xlu1 %v462_v31 }
  0xf9   : > { %469 = vmax.xlane.f32.xlu1 %v468_v32 }
 0x17e   : > { %v467_v36 = vpop.xlane.xlu1 %466 }
 0x17f   : > { %v473_v37 = vmax.f32 %v1057_v34, %v467_v36  ;;  %v461_v38 = vpop.xlane.xlu0 %460 }
 0x180   : > { %v471_v39 = vmax.f32 %v454_v35, %v461_v38 }
 0x181   : > { %v477_v41 = vsub.f32 %v1057_v34, %v473_v37  ;;  %651 = vst.msk [vmem:[#allocation2 + $0x10] sm:$0xff] %vm349_vm1, %v473_v37 }
 0x182   : > { %v475_v42 = vsub.f32 %v454_v35, %v471_v39  ;;  %649 = vst.msk [vmem:[#allocation2] sm:$0xff] %vm349_vm1, %v471_v39  ;;  %v464_v43 = vpop.xlane.xlu1 %463  ;;  %489 = vperm.xlu1 %920, %v471_v39  }
 0x183   : > { %v472_v44 = vmax.f32 %v455_v40, %v464_v43  ;;  %v483_v11 = vmul.f32 1.442695, %v477_v41  ;;  %v550_v43 = vld [vmem:[#allocation4 + $0x10] sm:$0xff] }
 0x184   : > { %v479_v10 = vmul.f32 1.442695, %v475_v42 }
 0x185   : > { %v476_v46 = vsub.f32 %v455_v40, %v472_v44  ;;  %650 = vst.msk [vmem:[#allocation2 + $0x8] sm:$0xff] %vm349_vm1, %v472_v44 }
 0x186   : > { %v470_v47 = vpop.xlane.xlu1 %469  ;;  %494 = vperm.xlu1 %920, %v472_v44   ;;  %v548_v44 = vld [vmem:[#allocation4] sm:$0xff] }
 0x187   : > { %v474_v48 = vmax.f32 %v457_v45, %v470_v47  ;;  %v481_v8 = vmul.f32 1.442695, %v476_v46  ;;  %v549_v47 = vld [vmem:[#allocation4 + $0x8] sm:$0xff] }
 0x189   : > { %v478_v49 = vsub.f32 %v457_v45, %v474_v48  ;;  %652 = vst.msk [vmem:[#allocation2 + $0x18] sm:$0xff] %vm349_vm1, %v474_v48  ;;  %504 = vperm.xlu0 %919, %v474_v48   ;;  %v551_v45 = vld [vmem:[#allocation4 + $0x18] sm:$0xff] }
 0x18a   : > { %499 = vperm.xlu1 %920, %v473_v37  }
 0x18b   : > { %v485_v12 = vmul.f32 1.442695, %v478_v49 }
 0x201   : > { %v490_v51 = vpop.permute.xlu1 %489 }
 0x202   : > { %v507_v52 = vsub.f32 %v440_v24, %v490_v51  ;;  %v521_v24 = vld [vmem:[#allocation3 + $0x10] sm:$0xff] }
 0x204   : > { %v511_v53 = vmul.f32 1.442695, %v507_v52 }
 0x205   : > { %v495_v54 = vpop.permute.xlu1 %494 }
 0x206   : > { %923 = vpow2.f32 %v511_v53  ;;  %v508_v55 = vsub.f32 %v443_v29, %v495_v54 }
 0x208   : > { %v513_v56 = vmul.f32 1.442695, %v508_v55  ;;  %v505_v57 = vpop.permute.xlu0 %504 }
 0x209   : > { %v510_v58 = vsub.f32 %v451_v26, %v505_v57  ;;  %v500_v59 = vpop.permute.xlu1 %499 }
 0x20a   : > { %925 = vpow2.f32 %v513_v56  ;;  %v509_v60 = vsub.f32 %v1042_v22, %v500_v59 }
 0x20b   : > { %v517_v61 = vmul.f32 1.442695, %v510_v58 }
 0x20c   : > { %v515_v62 = vmul.f32 1.442695, %v509_v60 }
 0x20d   : > { %927 = vpow2.f32 %v517_v61 }
 0x20e   : > { %929 = vpow2.f32 %v515_v62 }
 0x20f   : > { %931 = vpow2.f32 %v481_v8 }
 0x210   : > { %v924_v63 = vpop.eup %923  ;;  %933 = vpow2.f32 %v479_v10 }
 0x211   : > { %v527_v0 = vsel %vm458_vm3, %v924_v63, 0.0  ;;  %935 = vpow2.f32 %v483_v11 }
 0x212   : > { %528 = vadd.xlane.f32.xlu1 %v527_v0  ;;  %937 = vpow2.f32 %v485_v12 }
 0x214   : > { %v926_v1 = vpop.eup %925 }
 0x215   : > { %v530_v2 = vsel %vm458_vm3, %v926_v1, 0.0  ;;  %v576_v3 = vpack.c.bf16 %v926_v1, %v924_v63 }
 0x216   : > { %531 = vadd.xlane.f32.xlu0 %v530_v2 }
 0x217   : > { %v928_v4 = vpop.eup %927  ;;  %887 = vmatprep.mubr.msk.bf16.mxu1 %vm458_vm3, %v576_v3 }
 0x218   : > { %v930_v5 = vpop.eup %929  ;;  %v536_v9 = vsel %vm458_vm3, %v928_v4, 0.0 }
 0x219   : > { %v533_v6 = vsel %vm458_vm3, %v930_v5, 0.0  ;;  %v577_v7 = vpack.c.bf16 %v928_v4, %v930_v5  ;;  %v932_v13 = vpop.eup %931 }
 0x21a   : > { %534 = vadd.xlane.f32.xlu1 %v533_v6  ;;  %v934_v14 = vpop.eup %933  ;;  %v524_v22 = vmul.f32 %v932_v13, %v520_v20 }
 0x21b   : > { %888 = vmatmul.mubr.msk.bf16.vlgmr.msra.gmra.mrb[0].mxu1 %vm458_vm3, %v577_v7  ;;  %v936_v15 = vpop.eup %935  ;;  %v523_v18 = vmul.f32 %v934_v14, %v519_v17 }
 0x21c   : > { %v938_v16 = vpop.eup %937  ;;  %v525_v26 = vmul.f32 %v936_v15, %v521_v24 }
 0x21d   : > { %v526_v31 = vmul.f32 %v938_v16, %v522_v28 }
 0x21e   : > { %537 = vadd.xlane.f32.xlu1 %v536_v9 }
 0x22c   : > { %559 = vperm.xlu0 %919, %v932_v13  }
 0x22f   : > { %554 = vperm.xlu1 %920, %v934_v14  }
 0x233   : > { %564 = vperm.xlu1 %920, %v936_v15  }
 0x237   : > { %569 = vperm.xlu1 %920, %v938_v16  }
 0x29f   : > { %v529_v19 = vpop.xlane.xlu1 %528 }
 0x2a0   : > { %v539_v21 = vadd.f32 %v529_v19, %v523_v18 }
 0x2a2   : > { %544 = vst.msk [vmem:[#allocation3] sm:$0xff] %vm349_vm1, %v539_v21 }
 0x2a3   : > { %v532_v23 = vpop.xlane.xlu0 %531 }
 0x2a4   : > { %v540_v25 = vadd.f32 %v532_v23, %v524_v22 }
 0x2a6   : > { %545 = vst.msk [vmem:[#allocation3 + $0x8] sm:$0xff] %vm349_vm1, %v540_v25 }
 0x2a7   : > { %v535_v27 = vpop.xlane.xlu1 %534 }
 0x2a8   : > { %v541_v29 = vadd.f32 %v535_v27, %v525_v26 }
 0x2a9   : > { %v660_v30 = vld [vmem:[#allocation3] sm:$0xff] }
 0x2aa   : > { %546 = vst.msk [vmem:[#allocation3 + $0x10] sm:$0xff] %vm349_vm1, %v541_v29  ;;  %939 = vrcp.f32 %v660_v30 }
 0x2ab   : > { %v538_v32 = vpop.xlane.xlu1 %537  ;;  %v560_v48 = vpop.permute.xlu0 %559 }
 0x2ac   : > { %v542_v33 = vadd.f32 %v538_v32, %v526_v31  ;;  %v573_v55 = vmul.f32 %v560_v48, %v549_v47 }
 0x2ad   : > { %v661_v34 = vld [vmem:[#allocation3 + $0x8] sm:$0xff] }
 0x2ae   : > { %547 = vst.msk [vmem:[#allocation3 + $0x18] sm:$0xff] %vm349_vm1, %v542_v33  ;;  %941 = vrcp.f32 %v661_v34 }
 0x2af   : > { %v555_v41 = vpop.permute.xlu1 %554 }
 0x2b0   : > { %v572_v50 = vmul.f32 %v555_v41, %v548_v44 }
 0x2b1   : > { %v662_v35 = vld [vmem:[#allocation3 + $0x10] sm:$0xff] }
 0x2b2   : > { %943 = vrcp.f32 %v662_v35 }
 0x2b3   : > { %v565_v42 = vpop.permute.xlu1 %564 }
 0x2b4   : > { %v940_v36 = vpop.eup %939  ;;  %v574_v49 = vmul.f32 %v565_v42, %v550_v43 }
 0x2b5   : > { %670 = vperm.xlu1 %920, %v940_v36   ;;  %v663_v37 = vld [vmem:[#allocation3 + $0x18] sm:$0xff] }
 0x2b6   : > { %945 = vrcp.f32 %v663_v37 }
 0x2b7   : > { %v570_v46 = vpop.permute.xlu1 %569 }
 0x2b8   : > { %v942_v38 = vpop.eup %941  ;;  %v575_v52 = vmul.f32 %v570_v46, %v551_v45 }
 0x2b9   : > { %675 = vperm.xlu0 %919, %v942_v38  }
 0x2bc   : > { %v944_v39 = vpop.eup %943 }
 0x2bd   : > { %680 = vperm.xlu1 %920, %v944_v39  }
 0x2c0   : > { %v946_v40 = vpop.eup %945 }
 0x2c1   : > { %685 = vperm.xlu0 %919, %v946_v40  }
 0x2ee   : > { %v889_v51 = vpop.f32.mrb[0].mxu1 }
 0x2ef   : > { %v643_v53 = vadd.f32 %v889_v51, %v574_v49  ;;  %v626_v54 = vpop.f32.mrb[1].mxu1 }
 0x2f0   : > { %v641_v56 = vadd.f32 %v626_v54, %v572_v50  ;;  %v890_v57 = vpop.f32.mrb[2].mxu1 }
 0x2f1   : > { %647 = vst.msk [vmem:[#allocation4 + $0x10] sm:$0xff] %vm358_vm0, %v643_v53  ;;  %v644_v58 = vadd.f32 %v890_v57, %v575_v52  ;;  %v629_v59 = vpop.f32.mrb[3].mxu1 }
 0x2f2   : > { %645 = vst.msk [vmem:[#allocation4] sm:$0xff] %vm358_vm0, %v641_v56  ;;  %v642_v60 = vadd.f32 %v629_v59, %v573_v55 }
 0x2f3   : > { %648 = vst.msk [vmem:[#allocation4 + $0x18] sm:$0xff] %vm358_vm0, %v644_v58 }
 0x2f4   : > { %646 = vst.msk [vmem:[#allocation4 + $0x8] sm:$0xff] %vm358_vm0, %v642_v60 }
 0x2f8   : > { %v658_v5 = vld [vmem:[#allocation4 + $0x10] sm:$0xff] }
 0x2f9   : > { %v656_v61 = vld [vmem:[#allocation4] sm:$0xff] }
 0x2fa   : > { %v659_v9 = vld [vmem:[#allocation4 + $0x18] sm:$0xff] }
 0x2fb   : > { %v657_v1 = vld [vmem:[#allocation4 + $0x8] sm:$0xff] }
 0x334   : > { %v671_v62 = vpop.permute.xlu1 %670 }
 0x335   : > { %v688_v63 = vmul.f32 %v671_v62, %v656_v61 }
 0x337   : > { %v692_v0 = vpack.c.bf16 %v688_v63, %v688_v63 }
 0x338   : > { %v676_v2 = vpop.permute.xlu0 %675 }
 0x339   : > { %697 = vst.msk [vmem:[%s342_s8] sm:$0xf] %vm696_vm4, %v692_v0  ;;  %v689_v3 = vmul.f32 %v676_v2, %v657_v1 }
 0x33b   : > { %v693_v4 = vpack.c.bf16 %v689_v3, %v689_v3 }
 0x33c   : > { %v681_v6 = vpop.permute.xlu1 %680 }
 0x33d   : > { %698 = vst.msk [vmem:[%s342_s8 + $0x4] sm:$0xf] %vm696_vm4, %v693_v4  ;;  %v690_v7 = vmul.f32 %v681_v6, %v658_v5 }
 0x33f   : > { %v694_v8 = vpack.c.bf16 %v690_v7, %v690_v7 }
 0x340   : > { %v686_v10 = vpop.permute.xlu0 %685 }
 0x341   : > { %699 = vst.msk [vmem:[%s342_s8 + $0x8] sm:$0xf] %vm696_vm4, %v694_v8  ;;  %v691_v11 = vmul.f32 %v686_v10, %v659_v9 }
 0x343   : > { %v695_v12 = vpack.c.bf16 %v691_v11, %v691_v11 }
 0x345   : > { %700 = vst.msk [vmem:[%s342_s8 + $0xc] sm:$0xf] %vm696_vm4, %v695_v12 }
 0x346 PF: > { %s14_s17 = sadd.s32 1, %s969_s17   ;;  %s1108_s15 = smov %s965_s16 }
 0x347   : > { %p11_p5 = scmp.ge.s32.totalorder %s14_s17, 4   ;;  %s1109_s16 = smov %s1111_s18 }
 0x349   :  { %13 = sbr.rel (!%p11_p5) target bundleno = 2 (0x2), region = 80 }

</bundles_post_ra>
